<compile_context>
chip_gen: v5e
topology: v5e:2x2
jax: 0.10.0
libtpu: 0.0.40
codegen_flags: <defaults>
</compile_context>

<pallas_src>
import functools

import jax
import jax.numpy as jnp
from jax.experimental import pallas as pl
from jax.experimental.pallas import tpu as pltpu

LANE = 128
SUBLANE = 8


def _round_up(x, m):
    return (x + m - 1) // m * m


# ---------------------------------------------------------------------------
# In-kernel helpers.
# ---------------------------------------------------------------------------
def _bigru_level(gi_ref, hid_ref, n_steps, period, Bp, H, wh_bf, bh):
    """Fused-direction bidirectional GRU recurrence over `n_steps` steps.

    gi_ref:  (n_steps*Bp, 6H) f32 precomputed input-gate activations (input bias
             included), gate-grouped columns [r_f r_b z_f z_b n_f n_b]; rows
             [k*Bp, (k+1)*Bp) belong to time step k.
    hid_ref: (n_steps*Bp, 2H) f32 output buffer [h_f | h_b], written time-aligned
             (fwd half at step k, bwd half at the mirrored step), so no post-loop
             relayout is needed.
    period:  length of one bidirectional segment (W for the word level -- the
             hidden state is still carried across sentences, matching PyTorch's
             re-feeding of h_n -- and S == n_steps for the sentence level).
    wh_bf:   (2H, 6H) bf16 block-diagonal recurrent weights, same column layout.
    bh:      (1, 6H)  f32 recurrent bias.
    """
    H2 = 2 * H
    lane = jax.lax.broadcasted_iota(jnp.int32, (Bp, 3 * H2), 1)
    fwd_lane = ((lane < H)
                | ((lane >= H2) & (lane < H2 + H))
                | ((lane >= 2 * H2) & (lane < 2 * H2 + H)))

    def step(k, h):
        t = jax.lax.rem(k, jnp.int32(period))
        kb = k + (period - 1) - 2 * t                  # mirrored step (bwd dir)
        rf = pl.multiple_of(k * Bp, Bp)
        rb = pl.multiple_of(kb * Bp, Bp)
        # Forward lanes read this step's gi, backward lanes read the mirrored
        # step's gi (pure VPU select of two full-tile loads, off the h-chain).
        gi = jnp.where(fwd_lane,
                       gi_ref[pl.ds(rf, Bp), :],
                       gi_ref[pl.ds(rb, Bp), :])
        gh = jnp.dot(h.astype(jnp.bfloat16), wh_bf,
                     preferred_element_type=jnp.float32) + bh
        r = jax.nn.sigmoid(gi[:, 0:H2] + gh[:, 0:H2])
        z = jax.nn.sigmoid(gi[:, H2:2 * H2] + gh[:, H2:2 * H2])
        n = jnp.tanh(gi[:, 2 * H2:3 * H2] + r * gh[:, 2 * H2:3 * H2])
        h = (1.0 - z) * n + z * h                      # (Bp, 2H) = [h_f(k)|h_b(kb)]
        hid_ref[pl.ds(rf, Bp), 0:H] = h[:, 0:H]        # fwd output, time k
        hid_ref[pl.ds(rb, Bp), H:H2] = h[:, H:H2]      # bwd output, time kb
        return h

    jax.lax.fori_loop(0, n_steps, step, jnp.zeros((Bp, H2), jnp.float32))


def _attention(hid, att_w_bf, att_b, ctx_row, seg):
    """HAN attention pooling over time, batched over all segments at once.

    hid: (rows, 2H) f32 time-aligned GRU outputs.
    seg: (groups, rows) f32 0/1 selector; the softmax numerator & denominator
         segment sums become two small MXU matmuls (no reshapes / sublane
         reductions).  Scores are tanh-bounded so no max-shift is needed.
    """
    u = jnp.tanh(jnp.dot(hid.astype(jnp.bfloat16), att_w_bf,
                         preferred_element_type=jnp.float32) + att_b)
    sc = jnp.tanh(jnp.sum(u * ctx_row, axis=-1, keepdims=True))   # (rows, 1)
    e = jnp.exp(sc)
    num = jnp.dot(seg, e * hid, preferred_element_type=jnp.float32)
    den = jnp.dot(seg, e, preferred_element_type=jnp.float32)
    return num / den                                               # (groups, 2H)


def _han_kernel(x_ref, w_ref, v_ref, segw_ref, out_ref,
                gi_w, hid_w, gi_s, hid_s,
                *, S, W, Bp, E, Hw, Hs, w_offs, v_offs):
    f32 = jnp.float32
    bf16 = jnp.bfloat16
    ow_wi, ow_wh, ow_att, os_wi, os_wh, os_att, o_fc = w_offs
    (ov_wbi, ov_wbh, ov_watb, ov_wctx,
     ov_sbi, ov_sbh, ov_satb, ov_sctx, ov_fcb, ov_segs) = v_offs

    # ---- Word level: all input-gate projections in ONE bf16 matmul ---------
    gi_w[...] = (jnp.dot(x_ref[...], w_ref[ow_wi:ow_wi + E, 0:6 * Hw],
                         preferred_element_type=f32)
                 + v_ref[ov_wbi:ov_wbi + 1, 0:6 * Hw])
    _bigru_level(gi_w, hid_w, S * W, W, Bp, Hw,
                 w_ref[ow_wh:ow_wh + 2 * Hw, 0:6 * Hw],
                 v_ref[ov_wbh:ov_wbh + 1, 0:6 * Hw])
    sent_vec = _attention(hid_w[...],
                          w_ref[ow_att:ow_att + 2 * Hw, 0:2 * Hw],
                          v_ref[ov_watb:ov_watb + 1, 0:2 * Hw],
                          v_ref[ov_wctx:ov_wctx + 1, 0:2 * Hw],
                          segw_ref[...])                    # (S*Bp, 2Hw)

    # ---- Sentence level -----------------------------------------------------
    gi_s[...] = (jnp.dot(sent_vec.astype(bf16),
                         w_ref[os_wi:os_wi + 2 * Hw, 0:6 * Hs],
                         preferred_element_type=f32)
                 + v_ref[ov_sbi:ov_sbi + 1, 0:6 * Hs])
    _bigru_level(gi_s, hid_s, S, S, Bp, Hs,
                 w_ref[os_wh:os_wh + 2 * Hs, 0:6 * Hs],
                 v_ref[ov_sbh:ov_sbh + 1, 0:6 * Hs])
    doc_vec = _attention(hid_s[...],
                         w_ref[os_att:os_att + 2 * Hs, 0:2 * Hs],
                         v_ref[ov_satb:ov_satb + 1, 0:2 * Hs],
                         v_ref[ov_sctx:ov_sctx + 1, 0:2 * Hs],
                         v_ref[ov_segs:ov_segs + Bp, 0:S * Bp])   # (Bp, 2Hs)

    # ---- Classifier, lane-dense (Bp, 128) output ---------------------------
    out_ref[...] = (jnp.dot(doc_vec.astype(bf16), w_ref[o_fc:o_fc + 2 * Hs, :],
                            preferred_element_type=f32)
                    + v_ref[ov_fcb:ov_fcb + 1, :])


# ---------------------------------------------------------------------------
# Wrapper-side layout plumbing (pure layout work, done once under jit).
# ---------------------------------------------------------------------------
def _interleave_gate_cols(a_f, a_b, H):
    """(R, 3H) fwd + (R, 3H) bwd -> (R, 6H) gate-grouped [r_f r_b z_f z_b n_f n_b]."""
    cols = []
    for g in range(3):
        cols.append(a_f[:, g * H:(g + 1) * H])
        cols.append(a_b[:, g * H:(g + 1) * H])
    return jnp.concatenate(cols, axis=1)


def _block_diag_gate_cols(w_f, w_b, H):
    """(H, 3H) fwd + (H, 3H) bwd -> (2H, 6H) block-diagonal, gate-grouped."""
    z = jnp.zeros((H, H), jnp.float32)
    cols = []
    for g in range(3):
        cols.append(jnp.concatenate([w_f[:, g * H:(g + 1) * H], z], axis=0))
        cols.append(jnp.concatenate([z, w_b[:, g * H:(g + 1) * H]], axis=0))
    return jnp.concatenate(cols, axis=1)


def _pack_slab(arrays, dtype, row_align):
    """Stack 2-D arrays into one lane-padded (rows, 128) slab; return offsets."""
    offs, row = [], 0
    for a in arrays:
        row = _round_up(row, row_align)
        offs.append(row)
        row += a.shape[0]
    slab = jnp.zeros((_round_up(row, row_align), LANE), dtype)
    for a, o in zip(arrays, offs):
        slab = slab.at[o:o + a.shape[0], :a.shape[1]].set(a.astype(dtype))
    return slab, tuple(offs)


def han_forward(tokens, emb_matrix, word_params, sent_params):
    B, S, W = tokens.shape
    E = emb_matrix.shape[1]
    Hw = word_params["wh_f"].shape[0]
    Hs = sent_params["wh_f"].shape[0]
    C = sent_params["fc_w"].shape[1]
    Bp = _round_up(max(B, SUBLANE), SUBLANE)          # padded batch rows

    assert 6 * Hw <= LANE and 6 * Hs <= LANE and C <= LANE and S * Bp <= LANE

    # Embedding lookup + the permutes of HAN.forward / WordAttNet.  Batch is
    # padded to Bp rows so every per-step scratch access is a full, 8-aligned
    # sublane tile.  Row (s*W + t)*Bp + b holds word t of sentence s, doc b.
    emb = emb_matrix[tokens].astype(jnp.float32)       # (B, S, W, E)
    emb = jnp.transpose(emb, (1, 2, 0, 3))             # (S, W, B, E)
    emb = jnp.pad(emb, ((0, 0), (0, 0), (0, Bp - B), (0, 0)))
    x = emb.reshape(S * W * Bp, E).astype(jnp.bfloat16)

    wp, sp = word_params, sent_params
    w_wi = _interleave_gate_cols(wp["wi_f"], wp["wi_b"], Hw)   # (E,   6Hw)
    w_wh = _block_diag_gate_cols(wp["wh_f"], wp["wh_b"], Hw)   # (2Hw, 6Hw)
    w_bi = _interleave_gate_cols(wp["bi_f"], wp["bi_b"], Hw)   # (1,   6Hw)
    w_bh = _interleave_gate_cols(wp["bh_f"], wp["bh_b"], Hw)
    s_wi = _interleave_gate_cols(sp["wi_f"], sp["wi_b"], Hs)   # (2Hw, 6Hs)
    s_wh = _block_diag_gate_cols(sp["wh_f"], sp["wh_b"], Hs)   # (2Hs, 6Hs)
    s_bi = _interleave_gate_cols(sp["bi_f"], sp["bi_b"], Hs)
    s_bh = _interleave_gate_cols(sp["bh_f"], sp["bh_b"], Hs)

    fc_w = jnp.zeros((2 * Hs, LANE), jnp.float32).at[:, :C].set(sp["fc_w"])
    fc_b = jnp.zeros((1, LANE), jnp.float32).at[:, :C].set(sp["fc_b"])

    # Softmax segment-sum selectors (pooling over time == one MXU matmul).
    # Padding groups select padding rows so every denominator stays > 0.
    idx_w = jnp.arange(S * W * Bp)
    grp_w = (idx_w // (W * Bp)) * Bp + idx_w % Bp
    seg_w = (grp_w[None, :] == jnp.arange(S * Bp)[:, None]).astype(jnp.float32)
    idx_s = jnp.arange(S * Bp)
    seg_s = ((idx_s % Bp)[None, :] == jnp.arange(Bp)[:, None]).astype(jnp.float32)

    # Two lane-padded parameter slabs -> 4 input DMAs total (was 17).
    wslab, w_offs = _pack_slab(
        [w_wi, w_wh, wp["att_w"], s_wi, s_wh, sp["att_w"], fc_w],
        jnp.bfloat16, 16)
    vslab, v_offs = _pack_slab(
        [w_bi, w_bh, wp["att_b"], jnp.transpose(wp["ctx_w"]),
         s_bi, s_bh, sp["att_b"], jnp.transpose(sp["ctx_w"]),
         fc_b, seg_s],
        jnp.float32, 8)

    kern = functools.partial(_han_kernel, S=S, W=W, Bp=Bp, E=E, Hw=Hw, Hs=Hs,
                             w_offs=w_offs, v_offs=v_offs)

    # TODO(synk): on v7x, split Bp over a leading "parallel" grid axis so both
    # TensorCores are used; a single program is kept here (v5e/v6e have 1 TC).
    logits_pad = pl.pallas_call(
        kern,
        out_shape=jax.ShapeDtypeStruct((Bp, LANE), jnp.float32),
        grid=(1,),
        in_specs=[pl.BlockSpec(x.shape, lambda i: (0, 0)),
                  pl.BlockSpec(wslab.shape, lambda i: (0, 0)),
                  pl.BlockSpec(vslab.shape, lambda i: (0, 0)),
                  pl.BlockSpec(seg_w.shape, lambda i: (0, 0))],
        out_specs=pl.BlockSpec((Bp, LANE), lambda i: (0, 0)),
        scratch_shapes=[pltpu.VMEM((S * W * Bp, 6 * Hw), jnp.float32),  # gi word
                        pltpu.VMEM((S * W * Bp, 2 * Hw), jnp.float32),  # hid word
                        pltpu.VMEM((S * Bp, 6 * Hs), jnp.float32),      # gi sent
                        pltpu.VMEM((S * Bp, 2 * Hs), jnp.float32)],     # hid sent
        compiler_params=pltpu.CompilerParams(
            dimension_semantics=("arbitrary",)),
    )(x, wslab, vslab, seg_w)
    return logits_pad[:B, :C]


def init_params(key, vocab, E, Hw, Hs, C):
    ks = jax.random.split(key, 24)

    def nrm(k, shape, std=0.05):
        return (std * jax.random.normal(k, shape)).astype(jnp.float32)

    emb_matrix = nrm(ks[0], (vocab, E), std=0.1)
    word = dict(
        wi_f=nrm(ks[1], (E, 3 * Hw)), wh_f=nrm(ks[2], (Hw, 3 * Hw)),
        bi_f=nrm(ks[3], (1, 3 * Hw)), bh_f=nrm(ks[4], (1, 3 * Hw)),
        wi_b=nrm(ks[5], (E, 3 * Hw)), wh_b=nrm(ks[6], (Hw, 3 * Hw)),
        bi_b=nrm(ks[7], (1, 3 * Hw)), bh_b=nrm(ks[8], (1, 3 * Hw)),
        att_w=nrm(ks[9], (2 * Hw, 2 * Hw)), att_b=nrm(ks[10], (1, 2 * Hw)),
        ctx_w=nrm(ks[11], (2 * Hw, 1)),
    )
    sent = dict(
        wi_f=nrm(ks[12], (2 * Hw, 3 * Hs)), wh_f=nrm(ks[13], (Hs, 3 * Hs)),
        bi_f=nrm(ks[14], (1, 3 * Hs)), bh_f=nrm(ks[15], (1, 3 * Hs)),
        wi_b=nrm(ks[16], (2 * Hw, 3 * Hs)), wh_b=nrm(ks[17], (Hs, 3 * Hs)),
        bi_b=nrm(ks[18], (1, 3 * Hs)), bh_b=nrm(ks[19], (1, 3 * Hs)),
        att_w=nrm(ks[20], (2 * Hs, 2 * Hs)), att_b=nrm(ks[21], (1, 2 * Hs)),
        ctx_w=nrm(ks[22], (2 * Hs, 1)),
        fc_w=nrm(ks[23], (2 * Hs, C)),
        fc_b=jnp.zeros((1, C), jnp.float32),
    )
    return emb_matrix, word, sent


if __name__ == "__main__":
    # Small shapes consistent with HAN: batch=2, 4 sentences, 8 words/sentence,
    # vocab=50, embed=32, word_hidden=16, sent_hidden=16, num_classes=5.
    B, S, W = 2, 4, 8
    V, E = 50, 32
    Hw, Hs, C = 16, 16, 5

    key = jax.random.PRNGKey(0)
    k_tok, k_par = jax.random.split(key)
    tokens = jax.random.randint(k_tok, (B, S, W), 0, V, dtype=jnp.int32)
    emb_matrix, word_params, sent_params = init_params(k_par, V, E, Hw, Hs, C)

    logits = jax.jit(han_forward)(tokens, emb_matrix, word_params, sent_params)
    logits = jax.block_until_ready(logits)

    assert logits.shape == (B, C), logits.shape
    assert bool(jnp.all(jnp.isfinite(logits)))
    print("KERNEL_OK")
</pallas_src>

<mosaic_0001>
module attributes {stable_mosaic.version = 11 : i64} {
  func.func @_han_kernel(%arg0: i32, %arg1: memref<256x32xbf16, #tpu.memory_space<vmem>>, %arg2: memref<224x128xbf16, #tpu.memory_space<vmem>>, %arg3: memref<80x128xf32, #tpu.memory_space<vmem>>, %arg4: memref<32x256xf32, #tpu.memory_space<vmem>>, %arg5: memref<8x128xf32, #tpu.memory_space<vmem>>, %arg6: memref<256x96xf32, #tpu.memory_space<vmem>>, %arg7: memref<256x32xf32, #tpu.memory_space<vmem>>, %arg8: memref<32x96xf32, #tpu.memory_space<vmem>>, %arg9: memref<32x32xf32, #tpu.memory_space<vmem>>) attributes {dimension_semantics = [#tpu.dimension_semantics<arbitrary>], iteration_bounds = array<i64: 1>, scalar_prefetch = 0 : i64, scratch_operands = 4 : i64, tpu.core_type = #tpu.core_type<tc>, window_params = [{pipeline_mode = #tpu.pipeline_mode<synchronous>, transform_indices = @transform_0, window_bounds = array<i64: 256, 32>}, {pipeline_mode = #tpu.pipeline_mode<synchronous>, transform_indices = @transform_1, window_bounds = array<i64: 224, 128>}, {pipeline_mode = #tpu.pipeline_mode<synchronous>, transform_indices = @transform_2, window_bounds = array<i64: 80, 128>}, {pipeline_mode = #tpu.pipeline_mode<synchronous>, transform_indices = @transform_3, window_bounds = array<i64: 32, 256>}, {pipeline_mode = #tpu.pipeline_mode<synchronous>, transform_indices = @transform_4, window_bounds = array<i64: 8, 128>}]} {
    %c0 = arith.constant 0 : index
    %c0_0 = arith.constant 0 : index
    %0 = vector.load %arg1[%c0, %c0_0] : memref<256x32xbf16, #tpu.memory_space<vmem>>, vector<256x32xbf16>
    %c0_1 = arith.constant 0 : index
    %c0_2 = arith.constant 0 : index
    %1 = vector.load %arg2[%c0_1, %c0_2] : memref<224x128xbf16, #tpu.memory_space<vmem>>, vector<32x96xbf16>
    %cst = arith.constant dense<0.000000e+00> : vector<256x96xf32>
    %2 = tpu.matmul %0, %1, %cst {dimension_numbers = #tpu.dot_dimension_numbers<[1], [0], [0], [1], [0, 0, 1, 1], [], []>} : vector<256x32xbf16>, vector<32x96xbf16>, vector<256x96xf32> -> vector<256x96xf32>
    %c0_3 = arith.constant 0 : index
    %c0_4 = arith.constant 0 : index
    %3 = vector.load %arg3[%c0_3, %c0_4] : memref<80x128xf32, #tpu.memory_space<vmem>>, vector<1x96xf32>
    %4 = vector.broadcast %3 : vector<1x96xf32> to vector<256x96xf32>
    %5 = arith.addf %2, %4 : vector<256x96xf32>
    %c0_5 = arith.constant 0 : index
    %c0_6 = arith.constant 0 : index
    %6 = vector.load %arg6[%c0_5, %c0_6] : memref<256x96xf32, #tpu.memory_space<vmem>>, vector<256x96xf32>
    tpu.vector_store %arg6[%c0_5, %c0_6], %5 {strides = array<i32>} : memref<256x96xf32, #tpu.memory_space<vmem>>, vector<256x96xf32>,
    %c32 = arith.constant 32 : index
    %c0_7 = arith.constant 0 : index
    %7 = vector.load %arg2[%c32, %c0_7] : memref<224x128xbf16, #tpu.memory_space<vmem>>, vector<32x96xbf16>
    %c8 = arith.constant 8 : index
    %c0_8 = arith.constant 0 : index
    %8 = vector.load %arg3[%c8, %c0_8] : memref<80x128xf32, #tpu.memory_space<vmem>>, vector<1x96xf32>
    %9 = tpu.iota {dimensions = array<i32: 1>} : vector<8x96xi32>
    %c16_i32 = arith.constant 16 : i32
    %10 = vector.broadcast %c16_i32 : i32 to vector<8x96xi32>
    %11 = arith.cmpi slt, %9, %10 : vector<8x96xi32>
    %c32_i32 = arith.constant 32 : i32
    %12 = vector.broadcast %c32_i32 : i32 to vector<8x96xi32>
    %13 = arith.cmpi sge, %9, %12 : vector<8x96xi32>
    %c48_i32 = arith.constant 48 : i32
    %14 = vector.broadcast %c48_i32 : i32 to vector<8x96xi32>
    %15 = arith.cmpi slt, %9, %14 : vector<8x96xi32>
    %16 = arith.andi %13, %15 : vector<8x96xi1>
    %17 = arith.ori %11, %16 : vector<8x96xi1>
    %c64_i32 = arith.constant 64 : i32
    %18 = vector.broadcast %c64_i32 : i32 to vector<8x96xi32>
    %19 = arith.cmpi sge, %9, %18 : vector<8x96xi32>
    %c80_i32 = arith.constant 80 : i32
    %20 = vector.broadcast %c80_i32 : i32 to vector<8x96xi32>
    %21 = arith.cmpi slt, %9, %20 : vector<8x96xi32>
    %22 = arith.andi %19, %21 : vector<8x96xi1>
    %23 = arith.ori %17, %22 : vector<8x96xi1>
    %cst_9 = arith.constant 0.000000e+00 : f32
    %24 = vector.broadcast %cst_9 : f32 to vector<8x32xf32>
    %c0_i32 = arith.constant 0 : i32
    %c32_i32_10 = arith.constant 32 : i32
    %25 = arith.addi %c0_i32, %c32_i32_10 : i32
    %c1_i32 = arith.constant 1 : i32
    %26 = scf.for %arg10 = %c0_i32 to %25 step %c1_i32 iter_args(%arg11 = %24) -> (vector<8x32xf32>)  : i32 {
      %c8_i32 = arith.constant 8 : i32
      %105 = arith.remsi %arg10, %c8_i32 : i32
      %c7_i32 = arith.constant 7 : i32
      %106 = arith.addi %arg10, %c7_i32 : i32
      %c2_i32 = arith.constant 2 : i32
      %107 = arith.muli %c2_i32, %105 : i32
      %108 = arith.subi %106, %107 : i32
      %c8_i32_56 = arith.constant 8 : i32
      %109 = arith.muli %arg10, %c8_i32_56 : i32
      %110 = tpu.assume_multiple %109, 8 : i32
      %c8_i32_57 = arith.constant 8 : i32
      %111 = arith.muli %108, %c8_i32_57 : i32
      %112 = tpu.assume_multiple %111, 8 : i32
      %113 = arith.index_cast %110 : i32 to index
      %c0_58 = arith.constant 0 : index
      %114 = vector.load %arg6[%113, %c0_58] : memref<256x96xf32, #tpu.memory_space<vmem>>, vector<8x96xf32>
      %115 = arith.index_cast %112 : i32 to index
      %c0_59 = arith.constant 0 : index
      %116 = vector.load %arg6[%115, %c0_59] : memref<256x96xf32, #tpu.memory_space<vmem>>, vector<8x96xf32>
      %117 = arith.select %23, %114, %116 : vector<8x96xi1>, vector<8x96xf32>
      %118 = arith.truncf %arg11 : vector<8x32xf32> to vector<8x32xbf16>
      %cst_60 = arith.constant dense<0.000000e+00> : vector<8x96xf32>
      %119 = tpu.matmul %118, %7, %cst_60 {dimension_numbers = #tpu.dot_dimension_numbers<[1], [0], [0], [1], [0, 0, 1, 1], [], []>} : vector<8x32xbf16>, vector<32x96xbf16>, vector<8x96xf32> -> vector<8x96xf32>
      %120 = vector.broadcast %8 : vector<1x96xf32> to vector<8x96xf32>
      %121 = arith.addf %119, %120 : vector<8x96xf32>
      %122 = vector.extract_strided_slice %117 {offsets = [0, 0], sizes = [8, 32], strides = [1, 1]} : vector<8x96xf32> to vector<8x32xf32>
      %123 = vector.extract_strided_slice %121 {offsets = [0, 0], sizes = [8, 32], strides = [1, 1]} : vector<8x96xf32> to vector<8x32xf32>
      %124 = arith.addf %122, %123 : vector<8x32xf32>
      %125 = arith.negf %124 : vector<8x32xf32>
      %126 = math.exp %125 : vector<8x32xf32>
      %cst_61 = arith.constant 1.000000e+00 : f32
      %127 = vector.broadcast %cst_61 : f32 to vector<8x32xf32>
      %128 = arith.addf %127, %126 : vector<8x32xf32>
      %129 = arith.divf %127, %128 : vector<8x32xf32>
      %130 = vector.extract_strided_slice %117 {offsets = [0, 32], sizes = [8, 32], strides = [1, 1]} : vector<8x96xf32> to vector<8x32xf32>
      %131 = vector.extract_strided_slice %121 {offsets = [0, 32], sizes = [8, 32], strides = [1, 1]} : vector<8x96xf32> to vector<8x32xf32>
      %132 = arith.addf %130, %131 : vector<8x32xf32>
      %133 = arith.negf %132 : vector<8x32xf32>
      %134 = math.exp %133 : vector<8x32xf32>
      %cst_62 = arith.constant 1.000000e+00 : f32
      %135 = vector.broadcast %cst_62 : f32 to vector<8x32xf32>
      %136 = arith.addf %135, %134 : vector<8x32xf32>
      %137 = arith.divf %135, %136 : vector<8x32xf32>
      %138 = vector.extract_strided_slice %117 {offsets = [0, 64], sizes = [8, 32], strides = [1, 1]} : vector<8x96xf32> to vector<8x32xf32>
      %139 = vector.extract_strided_slice %121 {offsets = [0, 64], sizes = [8, 32], strides = [1, 1]} : vector<8x96xf32> to vector<8x32xf32>
      %140 = arith.mulf %129, %139 : vector<8x32xf32>
      %141 = arith.addf %138, %140 : vector<8x32xf32>
      %142 = math.tanh %141 : vector<8x32xf32>
      %cst_63 = arith.constant 1.000000e+00 : f32
      %143 = vector.broadcast %cst_63 : f32 to vector<8x32xf32>
      %144 = arith.subf %143, %137 : vector<8x32xf32>
      %145 = arith.mulf %144, %142 : vector<8x32xf32>
      %146 = arith.mulf %137, %arg11 : vector<8x32xf32>
      %147 = arith.addf %145, %146 : vector<8x32xf32>
      %148 = vector.extract_strided_slice %147 {offsets = [0, 0], sizes = [8, 16], strides = [1, 1]} : vector<8x32xf32> to vector<8x16xf32>
      %149 = arith.index_cast %110 : i32 to index
      %c0_64 = arith.constant 0 : index
      %150 = vector.load %arg7[%149, %c0_64] : memref<256x32xf32, #tpu.memory_space<vmem>>, vector<8x16xf32>
      tpu.vector_store %arg7[%149, %c0_64], %148 {strides = array<i32>} : memref<256x32xf32, #tpu.memory_space<vmem>>, vector<8x16xf32>,
      %151 = vector.extract_strided_slice %147 {offsets = [0, 16], sizes = [8, 16], strides = [1, 1]} : vector<8x32xf32> to vector<8x16xf32>
      %152 = arith.index_cast %112 : i32 to index
      %c16_65 = arith.constant 16 : index
      %153 = vector.load %arg7[%152, %c16_65] : memref<256x32xf32, #tpu.memory_space<vmem>>, vector<8x16xf32>
      tpu.vector_store %arg7[%152, %c16_65], %151 {strides = array<i32>} : memref<256x32xf32, #tpu.memory_space<vmem>>, vector<8x16xf32>,
      scf.yield %147 : vector<8x32xf32>
    }
    %c32_i32_11 = arith.constant 32 : i32
    %c0_12 = arith.constant 0 : index
    %c0_13 = arith.constant 0 : index
    %27 = vector.load %arg7[%c0_12, %c0_13] : memref<256x32xf32, #tpu.memory_space<vmem>>, vector<256x32xf32>
    %c64 = arith.constant 64 : index
    %c0_14 = arith.constant 0 : index
    %28 = vector.load %arg2[%c64, %c0_14] : memref<224x128xbf16, #tpu.memory_space<vmem>>, vector<32x32xbf16>
    %c16 = arith.constant 16 : index
    %c0_15 = arith.constant 0 : index
    %29 = vector.load %arg3[%c16, %c0_15] : memref<80x128xf32, #tpu.memory_space<vmem>>, vector<1x32xf32>
    %c24 = arith.constant 24 : index
    %c0_16 = arith.constant 0 : index
    %30 = vector.load %arg3[%c24, %c0_16] : memref<80x128xf32, #tpu.memory_space<vmem>>, vector<1x32xf32>
    %c0_17 = arith.constant 0 : index
    %c0_18 = arith.constant 0 : index
    %31 = vector.load %arg4[%c0_17, %c0_18] : memref<32x256xf32, #tpu.memory_space<vmem>>, vector<32x256xf32>
    %32 = arith.truncf %27 : vector<256x32xf32> to vector<256x32xbf16>
    %cst_19 = arith.constant dense<0.000000e+00> : vector<256x32xf32>
    %33 = tpu.matmul %32, %28, %cst_19 {dimension_numbers = #tpu.dot_dimension_numbers<[1], [0], [0], [1], [0, 0, 1, 1], [], []>} : vector<256x32xbf16>, vector<32x32xbf16>, vector<256x32xf32> -> vector<256x32xf32>
    %34 = vector.broadcast %29 : vector<1x32xf32> to vector<256x32xf32>
    %35 = arith.addf %33, %34 : vector<256x32xf32>
    %36 = math.tanh %35 : vector<256x32xf32>
    %37 = vector.broadcast %30 : vector<1x32xf32> to vector<256x32xf32>
    %38 = arith.mulf %36, %37 : vector<256x32xf32>
    %cst_20 = arith.constant dense<0.000000e+00> : vector<256xf32>
    %39 = vector.multi_reduction <add>, %38, %cst_20 [1] : vector<256x32xf32> to vector<256xf32>
    %40 = vector.shape_cast %39 : vector<256xf32> to vector<256x1xf32>
    %41 = math.tanh %40 : vector<256x1xf32>
    %42 = math.exp %41 : vector<256x1xf32>
    %43 = vector.broadcast %42 : vector<256x1xf32> to vector<256x32xf32>
    %44 = arith.mulf %43, %27 : vector<256x32xf32>
    %cst_21 = arith.constant dense<0.000000e+00> : vector<32x32xf32>
    %45 = tpu.matmul %31, %44, %cst_21 {dimension_numbers = #tpu.dot_dimension_numbers<[1], [0], [0], [1], [0, 0, 1, 1], [], []>} : vector<32x256xf32>, vector<256x32xf32>, vector<32x32xf32> -> vector<32x32xf32>
    %cst_22 = arith.constant dense<0.000000e+00> : vector<32x1xf32>
    %46 = tpu.matmul %31, %42, %cst_22 {dimension_numbers = #tpu.dot_dimension_numbers<[1], [0], [0], [1], [0, 0, 1, 1], [], []>} : vector<32x256xf32>, vector<256x1xf32>, vector<32x1xf32> -> vector<32x1xf32>
    %47 = vector.broadcast %46 : vector<32x1xf32> to vector<32x32xf32>
    %48 = arith.divf %45, %47 : vector<32x32xf32>
    %49 = arith.truncf %48 : vector<32x32xf32> to vector<32x32xbf16>
    %c96 = arith.constant 96 : index
    %c0_23 = arith.constant 0 : index
    %50 = vector.load %arg2[%c96, %c0_23] : memref<224x128xbf16, #tpu.memory_space<vmem>>, vector<32x96xbf16>
    %cst_24 = arith.constant dense<0.000000e+00> : vector<32x96xf32>
    %51 = tpu.matmul %49, %50, %cst_24 {dimension_numbers = #tpu.dot_dimension_numbers<[1], [0], [0], [1], [0, 0, 1, 1], [], []>} : vector<32x32xbf16>, vector<32x96xbf16>, vector<32x96xf32> -> vector<32x96xf32>
    %c32_25 = arith.constant 32 : index
    %c0_26 = arith.constant 0 : index
    %52 = vector.load %arg3[%c32_25, %c0_26] : memref<80x128xf32, #tpu.memory_space<vmem>>, vector<1x96xf32>
    %53 = vector.broadcast %52 : vector<1x96xf32> to vector<32x96xf32>
    %54 = arith.addf %51, %53 : vector<32x96xf32>
    %c0_27 = arith.constant 0 : index
    %c0_28 = arith.constant 0 : index
    %55 = vector.load %arg8[%c0_27, %c0_28] : memref<32x96xf32, #tpu.memory_space<vmem>>, vector<32x96xf32>
    tpu.vector_store %arg8[%c0_27, %c0_28], %54 {strides = array<i32>} : memref<32x96xf32, #tpu.memory_space<vmem>>, vector<32x96xf32>,
    %c128 = arith.constant 128 : index
    %c0_29 = arith.constant 0 : index
    %56 = vector.load %arg2[%c128, %c0_29] : memref<224x128xbf16, #tpu.memory_space<vmem>>, vector<32x96xbf16>
    %c40 = arith.constant 40 : index
    %c0_30 = arith.constant 0 : index
    %57 = vector.load %arg3[%c40, %c0_30] : memref<80x128xf32, #tpu.memory_space<vmem>>, vector<1x96xf32>
    %58 = tpu.iota {dimensions = array<i32: 1>} : vector<8x96xi32>
    %c16_i32_31 = arith.constant 16 : i32
    %59 = vector.broadcast %c16_i32_31 : i32 to vector<8x96xi32>
    %60 = arith.cmpi slt, %58, %59 : vector<8x96xi32>
    %c32_i32_32 = arith.constant 32 : i32
    %61 = vector.broadcast %c32_i32_32 : i32 to vector<8x96xi32>
    %62 = arith.cmpi sge, %58, %61 : vector<8x96xi32>
    %c48_i32_33 = arith.constant 48 : i32
    %63 = vector.broadcast %c48_i32_33 : i32 to vector<8x96xi32>
    %64 = arith.cmpi slt, %58, %63 : vector<8x96xi32>
    %65 = arith.andi %62, %64 : vector<8x96xi1>
    %66 = arith.ori %60, %65 : vector<8x96xi1>
    %c64_i32_34 = arith.constant 64 : i32
    %67 = vector.broadcast %c64_i32_34 : i32 to vector<8x96xi32>
    %68 = arith.cmpi sge, %58, %67 : vector<8x96xi32>
    %c80_i32_35 = arith.constant 80 : i32
    %69 = vector.broadcast %c80_i32_35 : i32 to vector<8x96xi32>
    %70 = arith.cmpi slt, %58, %69 : vector<8x96xi32>
    %71 = arith.andi %68, %70 : vector<8x96xi1>
    %72 = arith.ori %66, %71 : vector<8x96xi1>
    %cst_36 = arith.constant 0.000000e+00 : f32
    %73 = vector.broadcast %cst_36 : f32 to vector<8x32xf32>
    %c0_i32_37 = arith.constant 0 : i32
    %c4_i32 = arith.constant 4 : i32
    %74 = arith.addi %c0_i32_37, %c4_i32 : i32
    %c1_i32_38 = arith.constant 1 : i32
    %75 = scf.for %arg10 = %c0_i32_37 to %74 step %c1_i32_38 iter_args(%arg11 = %73) -> (vector<8x32xf32>)  : i32 {
      %c4_i32_56 = arith.constant 4 : i32
      %105 = arith.remsi %arg10, %c4_i32_56 : i32
      %c3_i32 = arith.constant 3 : i32
      %106 = arith.addi %arg10, %c3_i32 : i32
      %c2_i32 = arith.constant 2 : i32
      %107 = arith.muli %c2_i32, %105 : i32
      %108 = arith.subi %106, %107 : i32
      %c8_i32 = arith.constant 8 : i32
      %109 = arith.muli %arg10, %c8_i32 : i32
      %110 = tpu.assume_multiple %109, 8 : i32
      %c8_i32_57 = arith.constant 8 : i32
      %111 = arith.muli %108, %c8_i32_57 : i32
      %112 = tpu.assume_multiple %111, 8 : i32
      %113 = arith.index_cast %110 : i32 to index
      %c0_58 = arith.constant 0 : index
      %114 = vector.load %arg8[%113, %c0_58] : memref<32x96xf32, #tpu.memory_space<vmem>>, vector<8x96xf32>
      %115 = arith.index_cast %112 : i32 to index
      %c0_59 = arith.constant 0 : index
      %116 = vector.load %arg8[%115, %c0_59] : memref<32x96xf32, #tpu.memory_space<vmem>>, vector<8x96xf32>
      %117 = arith.select %72, %114, %116 : vector<8x96xi1>, vector<8x96xf32>
      %118 = arith.truncf %arg11 : vector<8x32xf32> to vector<8x32xbf16>
      %cst_60 = arith.constant dense<0.000000e+00> : vector<8x96xf32>
      %119 = tpu.matmul %118, %56, %cst_60 {dimension_numbers = #tpu.dot_dimension_numbers<[1], [0], [0], [1], [0, 0, 1, 1], [], []>} : vector<8x32xbf16>, vector<32x96xbf16>, vector<8x96xf32> -> vector<8x96xf32>
      %120 = vector.broadcast %57 : vector<1x96xf32> to vector<8x96xf32>
      %121 = arith.addf %119, %120 : vector<8x96xf32>
      %122 = vector.extract_strided_slice %117 {offsets = [0, 0], sizes = [8, 32], strides = [1, 1]} : vector<8x96xf32> to vector<8x32xf32>
      %123 = vector.extract_strided_slice %121 {offsets = [0, 0], sizes = [8, 32], strides = [1, 1]} : vector<8x96xf32> to vector<8x32xf32>
      %124 = arith.addf %122, %123 : vector<8x32xf32>
      %125 = arith.negf %124 : vector<8x32xf32>
      %126 = math.exp %125 : vector<8x32xf32>
      %cst_61 = arith.constant 1.000000e+00 : f32
      %127 = vector.broadcast %cst_61 : f32 to vector<8x32xf32>
      %128 = arith.addf %127, %126 : vector<8x32xf32>
      %129 = arith.divf %127, %128 : vector<8x32xf32>
      %130 = vector.extract_strided_slice %117 {offsets = [0, 32], sizes = [8, 32], strides = [1, 1]} : vector<8x96xf32> to vector<8x32xf32>
      %131 = vector.extract_strided_slice %121 {offsets = [0, 32], sizes = [8, 32], strides = [1, 1]} : vector<8x96xf32> to vector<8x32xf32>
      %132 = arith.addf %130, %131 : vector<8x32xf32>
      %133 = arith.negf %132 : vector<8x32xf32>
      %134 = math.exp %133 : vector<8x32xf32>
      %cst_62 = arith.constant 1.000000e+00 : f32
      %135 = vector.broadcast %cst_62 : f32 to vector<8x32xf32>
      %136 = arith.addf %135, %134 : vector<8x32xf32>
      %137 = arith.divf %135, %136 : vector<8x32xf32>
      %138 = vector.extract_strided_slice %117 {offsets = [0, 64], sizes = [8, 32], strides = [1, 1]} : vector<8x96xf32> to vector<8x32xf32>
      %139 = vector.extract_strided_slice %121 {offsets = [0, 64], sizes = [8, 32], strides = [1, 1]} : vector<8x96xf32> to vector<8x32xf32>
      %140 = arith.mulf %129, %139 : vector<8x32xf32>
      %141 = arith.addf %138, %140 : vector<8x32xf32>
      %142 = math.tanh %141 : vector<8x32xf32>
      %cst_63 = arith.constant 1.000000e+00 : f32
      %143 = vector.broadcast %cst_63 : f32 to vector<8x32xf32>
      %144 = arith.subf %143, %137 : vector<8x32xf32>
      %145 = arith.mulf %144, %142 : vector<8x32xf32>
      %146 = arith.mulf %137, %arg11 : vector<8x32xf32>
      %147 = arith.addf %145, %146 : vector<8x32xf32>
      %148 = vector.extract_strided_slice %147 {offsets = [0, 0], sizes = [8, 16], strides = [1, 1]} : vector<8x32xf32> to vector<8x16xf32>
      %149 = arith.index_cast %110 : i32 to index
      %c0_64 = arith.constant 0 : index
      %150 = vector.load %arg9[%149, %c0_64] : memref<32x32xf32, #tpu.memory_space<vmem>>, vector<8x16xf32>
      tpu.vector_store %arg9[%149, %c0_64], %148 {strides = array<i32>} : memref<32x32xf32, #tpu.memory_space<vmem>>, vector<8x16xf32>,
      %151 = vector.extract_strided_slice %147 {offsets = [0, 16], sizes = [8, 16], strides = [1, 1]} : vector<8x32xf32> to vector<8x16xf32>
      %152 = arith.index_cast %112 : i32 to index
      %c16_65 = arith.constant 16 : index
      %153 = vector.load %arg9[%152, %c16_65] : memref<32x32xf32, #tpu.memory_space<vmem>>, vector<8x16xf32>
      tpu.vector_store %arg9[%152, %c16_65], %151 {strides = array<i32>} : memref<32x32xf32, #tpu.memory_space<vmem>>, vector<8x16xf32>,
      scf.yield %147 : vector<8x32xf32>
    }
    %c4_i32_39 = arith.constant 4 : i32
    %c0_40 = arith.constant 0 : index
    %c0_41 = arith.constant 0 : index
    %76 = vector.load %arg9[%c0_40, %c0_41] : memref<32x32xf32, #tpu.memory_space<vmem>>, vector<32x32xf32>
    %c160 = arith.constant 160 : index
    %c0_42 = arith.constant 0 : index
    %77 = vector.load %arg2[%c160, %c0_42] : memref<224x128xbf16, #tpu.memory_space<vmem>>, vector<32x32xbf16>
    %c48 = arith.constant 48 : index
    %c0_43 = arith.constant 0 : index
    %78 = vector.load %arg3[%c48, %c0_43] : memref<80x128xf32, #tpu.memory_space<vmem>>, vector<1x32xf32>
    %c56 = arith.constant 56 : index
    %c0_44 = arith.constant 0 : index
    %79 = vector.load %arg3[%c56, %c0_44] : memref<80x128xf32, #tpu.memory_space<vmem>>, vector<1x32xf32>
    %c72 = arith.constant 72 : index
    %c0_45 = arith.constant 0 : index
    %80 = vector.load %arg3[%c72, %c0_45] : memref<80x128xf32, #tpu.memory_space<vmem>>, vector<8x32xf32>
    %81 = arith.truncf %76 : vector<32x32xf32> to vector<32x32xbf16>
    %cst_46 = arith.constant dense<0.000000e+00> : vector<32x32xf32>
    %82 = tpu.matmul %81, %77, %cst_46 {dimension_numbers = #tpu.dot_dimension_numbers<[1], [0], [0], [1], [0, 0, 1, 1], [], []>} : vector<32x32xbf16>, vector<32x32xbf16>, vector<32x32xf32> -> vector<32x32xf32>
    %83 = vector.broadcast %78 : vector<1x32xf32> to vector<32x32xf32>
    %84 = arith.addf %82, %83 : vector<32x32xf32>
    %85 = math.tanh %84 : vector<32x32xf32>
    %86 = vector.broadcast %79 : vector<1x32xf32> to vector<32x32xf32>
    %87 = arith.mulf %85, %86 : vector<32x32xf32>
    %cst_47 = arith.constant dense<0.000000e+00> : vector<32xf32>
    %88 = vector.multi_reduction <add>, %87, %cst_47 [1] : vector<32x32xf32> to vector<32xf32>
    %89 = vector.shape_cast %88 : vector<32xf32> to vector<32x1xf32>
    %90 = math.tanh %89 : vector<32x1xf32>
    %91 = math.exp %90 : vector<32x1xf32>
    %92 = vector.broadcast %91 : vector<32x1xf32> to vector<32x32xf32>
    %93 = arith.mulf %92, %76 : vector<32x32xf32>
    %cst_48 = arith.constant dense<0.000000e+00> : vector<8x32xf32>
    %94 = tpu.matmul %80, %93, %cst_48 {dimension_numbers = #tpu.dot_dimension_numbers<[1], [0], [0], [1], [0, 0, 1, 1], [], []>} : vector<8x32xf32>, vector<32x32xf32>, vector<8x32xf32> -> vector<8x32xf32>
    %cst_49 = arith.constant dense<0.000000e+00> : vector<8x1xf32>
    %95 = tpu.matmul %80, %91, %cst_49 {dimension_numbers = #tpu.dot_dimension_numbers<[1], [0], [0], [1], [0, 0, 1, 1], [], []>} : vector<8x32xf32>, vector<32x1xf32>, vector<8x1xf32> -> vector<8x1xf32>
    %96 = vector.broadcast %95 : vector<8x1xf32> to vector<8x32xf32>
    %97 = arith.divf %94, %96 : vector<8x32xf32>
    %98 = arith.truncf %97 : vector<8x32xf32> to vector<8x32xbf16>
    %c192 = arith.constant 192 : index
    %c0_50 = arith.constant 0 : index
    %99 = vector.load %arg2[%c192, %c0_50] : memref<224x128xbf16, #tpu.memory_space<vmem>>, vector<32x128xbf16>
    %cst_51 = arith.constant dense<0.000000e+00> : vector<8x128xf32>
    %100 = tpu.matmul %98, %99, %cst_51 {dimension_numbers = #tpu.dot_dimension_numbers<[1], [0], [0], [1], [0, 0, 1, 1], [], []>} : vector<8x32xbf16>, vector<32x128xbf16>, vector<8x128xf32> -> vector<8x128xf32>
    %c64_52 = arith.constant 64 : index
    %c0_53 = arith.constant 0 : index
    %101 = vector.load %arg3[%c64_52, %c0_53] : memref<80x128xf32, #tpu.memory_space<vmem>>, vector<1x128xf32>
    %102 = vector.broadcast %101 : vector<1x128xf32> to vector<8x128xf32>
    %103 = arith.addf %100, %102 : vector<8x128xf32>
    %c0_54 = arith.constant 0 : index
    %c0_55 = arith.constant 0 : index
    %104 = vector.load %arg5[%c0_54, %c0_55] : memref<8x128xf32, #tpu.memory_space<vmem>>, vector<8x128xf32>
    tpu.vector_store %arg5[%c0_54, %c0_55], %103 {strides = array<i32>} : memref<8x128xf32, #tpu.memory_space<vmem>>, vector<8x128xf32>,
    return
  }
  func.func @transform_0(%arg0: i32) -> (i32, i32) {
    %c0_i32 = arith.constant 0 : i32
    %c0_i32_0 = arith.constant 0 : i32
    %c0_i32_1 = arith.constant 0 : i32
    return %c0_i32, %c0_i32_0 : i32, i32
  }
  func.func @transform_1(%arg0: i32) -> (i32, i32) {
    %c0_i32 = arith.constant 0 : i32
    %c0_i32_0 = arith.constant 0 : i32
    %c0_i32_1 = arith.constant 0 : i32
    return %c0_i32, %c0_i32_0 : i32, i32
  }
  func.func @transform_2(%arg0: i32) -> (i32, i32) {
    %c0_i32 = arith.constant 0 : i32
    %c0_i32_0 = arith.constant 0 : i32
    %c0_i32_1 = arith.constant 0 : i32
    return %c0_i32, %c0_i32_0 : i32, i32
  }
  func.func @transform_3(%arg0: i32) -> (i32, i32) {
    %c0_i32 = arith.constant 0 : i32
    %c0_i32_0 = arith.constant 0 : i32
    %c0_i32_1 = arith.constant 0 : i32
    return %c0_i32, %c0_i32_0 : i32, i32
  }
  func.func @transform_4(%arg0: i32) -> (i32, i32) {
    %c0_i32 = arith.constant 0 : i32
    %c0_i32_0 = arith.constant 0 : i32
    %c0_i32_1 = arith.constant 0 : i32
    return %c0_i32, %c0_i32_0 : i32, i32
  }
}

</mosaic_0001>

<bundles_post_ra>
// kernel: han_forward.1
= control target key start
LH: loop header
LB: loop body
LE: loop exit
PB: predicated region body
PF: predicated region fallthrough
CT: control target
= control target key end

     0   :  { %vm148_vm0 = vcmask 261120   ;;  %vm286_vm1 = vcmask 785408   ;;  %v324_v52 = vlaneseq  ;;  %s2795_s1 = inlined_call_operand.vmem [shape: bf16[224,128], index: 1, kind: input, shape index: {}]   ;;  %s2796_s3 = inlined_call_operand.vmem [shape: f32[32,256], index: 3, kind: input, shape index: {}]   ;;  %s2797_s4 = inlined_call_operand.vmem [shape: f32[8,128], index: 4, kind: output, shape index: {}]   ;;  %s2798_s0 = inlined_call_operand.vmem [shape: bf16[256,32], index: 0, kind: input, shape index: {}]   ;;  %s2799_s2 = inlined_call_operand.vmem [shape: f32[80,128], index: 2, kind: input, shape index: {}]  }
   0x1   :  { %v1707_v0 = vld [vmem:[%s2795_s1 + $0x8] sm:$0xff]  ;;  %v2096_v1 = vld [vmem:[%s2795_s1 + $0x10] sm:$0xf]  ;;  %v2101_v2 = vld [vmem:[%s2795_s1 + $0x10] sm:$0xf0] }
   0x2   :  { %v2106_v3 = vld [vmem:[%s2795_s1 + $0x18] sm:$0xf]  ;;  %v2111_v4 = vld [vmem:[%s2795_s1 + $0x18] sm:$0xf0]  ;;  %203 = vmatpush.bf16.msra.mxu0 %v1707_v0  ;;  %1720 = vmatpush.bf16.msra.mxu1 %v1707_v0  ;;  %v1706_v5 = vld [vmem:[%s2795_s1] sm:$0xff]  ;;  %v325_v53 = vand.u32 127, %v324_v52 }
   0x3   :  { %1721 = vmatpush.bf16.msra.mxu2 %v1707_v0  ;;  %1722 = vmatpush.bf16.msra.mxu3 %v1707_v0  ;;  %v1690_v6 = vld [vmem:[%s2798_s0] sm:$0xff]  ;;  %v1691_v10 = vld [vmem:[%s2798_s0 + $0x8] sm:$0xff]  ;;  %v1692_v14 = vld [vmem:[%s2798_s0 + $0x10] sm:$0xff] }
   0x4   :  { %v1694_v7 = vld [vmem:[%s2798_s0 + $0x20] sm:$0xff]  ;;  %v1695_v11 = vld [vmem:[%s2798_s0 + $0x28] sm:$0xff]  ;;  %v1696_v15 = vld [vmem:[%s2798_s0 + $0x30] sm:$0xff]  ;;  %vm327_vm2 = vcmp.ge.s32.totalorder %v325_v53, 32  ;;  %vm328_vm3 = vcmp.lt.s32.totalorder %v325_v53, 48  ;;  %vm326_vm4 = vcmp.lt.s32.totalorder %v325_v53, 16 }
   0x5   :  { %v1698_v8 = vld [vmem:[%s2798_s0 + $0x40] sm:$0xff]  ;;  %v1699_v12 = vld [vmem:[%s2798_s0 + $0x48] sm:$0xff]  ;;  %v1700_v16 = vld [vmem:[%s2798_s0 + $0x50] sm:$0xff]  ;;  %vm331_vm6 = vcmp.ge.s32.totalorder %v325_v53, 64  ;;  %vm332_vm8 = vcmp.lt.s32.totalorder %v325_v53, 80 }
   0x6   :  { %204 = vmatpush.bf16.msra.mxu0 %v1706_v5  ;;  %1723 = vmatpush.bf16.msra.mxu1 %v1706_v5  ;;  %v1702_v9 = vld [vmem:[%s2798_s0 + $0x60] sm:$0xff]  ;;  %v1703_v13 = vld [vmem:[%s2798_s0 + $0x68] sm:$0xff]  ;;  %v1704_v17 = vld [vmem:[%s2798_s0 + $0x70] sm:$0xff] }
   0x7   :  { %1724 = vmatpush.bf16.msra.mxu2 %v1706_v5  ;;  %1725 = vmatpush.bf16.msra.mxu3 %v1706_v5  ;;  %v1693_v18 = vld [vmem:[%s2798_s0 + $0x18] sm:$0xff]  ;;  %v2183_v22 = vld [vmem:[%s2799_s2 + $0x8] sm:$0x1]  ;;  %v2188_v23 = vld [vmem:[%s2799_s2] ss:$0 sm:$0xff] }
   0x8   :  { %v1697_v19 = vld [vmem:[%s2798_s0 + $0x38] sm:$0xff]  ;;  %vm329_vm5 = vmand %vm327_vm2, %vm328_vm3 }
   0x9   :  { %1591 = vmatmul.msk.bf16.vlgmr.msra.gmra.mxu0 %vm148_vm0, %v1690_v6  ;;  %1595 = vmatmul.msk.bf16.vlgmr.msra.gmra.mxu1 %vm148_vm0, %v1694_v7  ;;  %v1701_v20 = vld [vmem:[%s2798_s0 + $0x58] sm:$0xff]  ;;  %vm2223_vm7 = vmor %vm326_vm4, %vm329_vm5 }
   0xa   :  { %1599 = vmatmul.msk.bf16.vlgmr.msra.gmra.mxu2 %vm148_vm0, %v1698_v8  ;;  %1603 = vmatmul.msk.bf16.vlgmr.msra.gmra.mxu3 %vm148_vm0, %v1702_v9  ;;  %v1705_v21 = vld [vmem:[%s2798_s0 + $0x78] sm:$0xff]  ;;  %vm2228_vm9 = vmand %vm331_vm6, %vm332_vm8  ;;  %s2268_s0 = smov 0  }
   0xb   :  { %vm334_vm10 = vmor %vm2223_vm7, %vm2228_vm9 }
  0x19   :  { %1592 = vmatmul.msk.bf16.gmra.mxu0 %vm148_vm0, %v1691_v10  ;;  %1596 = vmatmul.msk.bf16.gmra.mxu1 %vm148_vm0, %v1695_v11 }
  0x1a   :  { %1600 = vmatmul.msk.bf16.gmra.mxu2 %vm148_vm0, %v1699_v12  ;;  %1604 = vmatmul.msk.bf16.gmra.mxu3 %vm148_vm0, %v1703_v13 }
  0x29   :  { %1593 = vmatmul.msk.bf16.gmra.mxu0 %vm148_vm0, %v1692_v14  ;;  %1597 = vmatmul.msk.bf16.gmra.mxu1 %vm148_vm0, %v1696_v15 }
  0x2a   :  { %1601 = vmatmul.msk.bf16.gmra.mxu2 %vm148_vm0, %v1700_v16  ;;  %1605 = vmatmul.msk.bf16.gmra.mxu3 %vm148_vm0, %v1704_v17 }
  0x39   :  { %1594 = vmatmul.msk.bf16.gmra.mxu0 %vm148_vm0, %v1693_v18  ;;  %1598 = vmatmul.msk.bf16.gmra.mxu1 %vm148_vm0, %v1697_v19 }
  0x3a   :  { %1602 = vmatmul.msk.bf16.gmra.mxu2 %vm148_vm0, %v1701_v20  ;;  %1606 = vmatmul.msk.bf16.gmra.mxu3 %vm148_vm0, %v1705_v21 }
  0x86   :  { %v206_v24 = vpop.f32.mrf.mxu0  ;;  %v226_v25 = vpop.f32.mrf.mxu1 }
  0x87   :  { %v207_v26 = vadd.f32 %v2188_v23, %v206_v24  ;;  %v227_v27 = vadd.f32 %v2188_v23, %v226_v25 }
  0x89   :  { %287 = vst.msk [vmem:[#allocation2] sm:$0xff] %vm286_vm1, %v207_v26 }
  0x8a   :  { %295 = vst.msk [vmem:[#allocation2 + $0x40] sm:$0xff] %vm286_vm1, %v227_v27 }
  0x8d   :  { %v246_v28 = vpop.f32.mrf.mxu2  ;;  %v266_v29 = vpop.f32.mrf.mxu3 }
  0x8e   :  { %v247_v30 = vadd.f32 %v2188_v23, %v246_v28  ;;  %v267_v31 = vadd.f32 %v2188_v23, %v266_v29  ;;  %v208_v32 = vpop.f32.mrf.mxu0  ;;  %v228_v33 = vpop.f32.mrf.mxu1 }
  0x8f   :  { %v209_v34 = vadd.f32 %v2188_v23, %v208_v32  ;;  %v229_v35 = vadd.f32 %v2188_v23, %v228_v33 }
  0x90   :  { %303 = vst.msk [vmem:[#allocation2 + $0x80] sm:$0xff] %vm286_vm1, %v247_v30 }
  0x91   :  { %311 = vst.msk [vmem:[#allocation2 + $0xc0] sm:$0xff] %vm286_vm1, %v267_v31 }
  0x92   :  { %288 = vst.msk [vmem:[#allocation2 + $0x8] sm:$0xff] %vm286_vm1, %v209_v34  ;;  %v2266_v34 = vmov 0.0  }
  0x93   :  { %296 = vst.msk [vmem:[#allocation2 + $0x48] sm:$0xff] %vm286_vm1, %v229_v35 }
  0x95   :  { %v248_v36 = vpop.f32.mrf.mxu2  ;;  %v268_v37 = vpop.f32.mrf.mxu3 }
  0x96   :  { %v249_v38 = vadd.f32 %v2188_v23, %v248_v36  ;;  %v269_v39 = vadd.f32 %v2188_v23, %v268_v37  ;;  %v211_v40 = vpop.f32.mrf.mxu0  ;;  %v231_v41 = vpop.f32.mrf.mxu1 }
  0x97   :  { %v212_v42 = vadd.f32 %v2188_v23, %v211_v40  ;;  %v232_v43 = vadd.f32 %v2188_v23, %v231_v41 }
  0x98   :  { %304 = vst.msk [vmem:[#allocation2 + $0x88] sm:$0xff] %vm286_vm1, %v249_v38 }
  0x99   :  { %312 = vst.msk [vmem:[#allocation2 + $0xc8] sm:$0xff] %vm286_vm1, %v269_v39 }
  0x9a   :  { %289 = vst.msk [vmem:[#allocation2 + $0x10] sm:$0xff] %vm286_vm1, %v212_v42 }
  0x9b   :  { %297 = vst.msk [vmem:[#allocation2 + $0x50] sm:$0xff] %vm286_vm1, %v232_v43 }
  0x9d   :  { %v251_v44 = vpop.f32.mrf.mxu2  ;;  %v271_v45 = vpop.f32.mrf.mxu3 }
  0x9e   :  { %v252_v46 = vadd.f32 %v2188_v23, %v251_v44  ;;  %v272_v47 = vadd.f32 %v2188_v23, %v271_v45  ;;  %v213_v48 = vpop.f32.mrf.mxu0  ;;  %v233_v49 = vpop.f32.mrf.mxu1 }
  0x9f   :  { %v214_v50 = vadd.f32 %v2188_v23, %v213_v48  ;;  %v234_v51 = vadd.f32 %v2188_v23, %v233_v49 }
  0xa0   :  { %305 = vst.msk [vmem:[#allocation2 + $0x90] sm:$0xff] %vm286_vm1, %v252_v46 }
  0xa1   :  { %313 = vst.msk [vmem:[#allocation2 + $0xd0] sm:$0xff] %vm286_vm1, %v272_v47 }
  0xa2   :  { %290 = vst.msk [vmem:[#allocation2 + $0x18] sm:$0xff] %vm286_vm1, %v214_v50 }
  0xa3   :  { %298 = vst.msk [vmem:[#allocation2 + $0x58] sm:$0xff] %vm286_vm1, %v234_v51 }
  0xa5   :  { %v253_v54 = vpop.f32.mrf.mxu2  ;;  %v273_v55 = vpop.f32.mrf.mxu3 }
  0xa6   :  { %v254_v56 = vadd.f32 %v2188_v23, %v253_v54  ;;  %v274_v57 = vadd.f32 %v2188_v23, %v273_v55  ;;  %v216_v58 = vpop.f32.mrf.mxu0  ;;  %v236_v59 = vpop.f32.mrf.mxu1 }
  0xa7   :  { %v217_v60 = vadd.f32 %v2188_v23, %v216_v58  ;;  %v237_v61 = vadd.f32 %v2188_v23, %v236_v59 }
  0xa8   :  { %306 = vst.msk [vmem:[#allocation2 + $0x98] sm:$0xff] %vm286_vm1, %v254_v56 }
  0xa9   :  { %314 = vst.msk [vmem:[#allocation2 + $0xd8] sm:$0xff] %vm286_vm1, %v274_v57 }
  0xaa   :  { %291 = vst.msk [vmem:[#allocation2 + $0x20] sm:$0xff] %vm286_vm1, %v217_v60 }
  0xab   :  { %299 = vst.msk [vmem:[#allocation2 + $0x60] sm:$0xff] %vm286_vm1, %v237_v61 }
  0xad   :  { %v256_v0 = vpop.f32.mrf.mxu2  ;;  %v276_v5 = vpop.f32.mrf.mxu3 }
  0xae   :  { %v257_v6 = vadd.f32 %v2188_v23, %v256_v0  ;;  %v277_v7 = vadd.f32 %v2188_v23, %v276_v5  ;;  %v218_v8 = vpop.f32.mrf.mxu0  ;;  %v238_v9 = vpop.f32.mrf.mxu1 }
  0xaf   :  { %v219_v10 = vadd.f32 %v2188_v23, %v218_v8  ;;  %v239_v11 = vadd.f32 %v2188_v23, %v238_v9 }
  0xb0   :  { %307 = vst.msk [vmem:[#allocation2 + $0xa0] sm:$0xff] %vm286_vm1, %v257_v6 }
  0xb1   :  { %315 = vst.msk [vmem:[#allocation2 + $0xe0] sm:$0xff] %vm286_vm1, %v277_v7 }
  0xb2   :  { %292 = vst.msk [vmem:[#allocation2 + $0x28] sm:$0xff] %vm286_vm1, %v219_v10 }
  0xb3   :  { %300 = vst.msk [vmem:[#allocation2 + $0x68] sm:$0xff] %vm286_vm1, %v239_v11 }
  0xb5   :  { %v258_v12 = vpop.f32.mrf.mxu2  ;;  %v278_v13 = vpop.f32.mrf.mxu3 }
  0xb6   :  { %v259_v14 = vadd.f32 %v2188_v23, %v258_v12  ;;  %v279_v15 = vadd.f32 %v2188_v23, %v278_v13  ;;  %v221_v16 = vpop.f32.mrf.mxu0  ;;  %v241_v17 = vpop.f32.mrf.mxu1 }
  0xb7   :  { %v222_v18 = vadd.f32 %v2188_v23, %v221_v16  ;;  %v242_v19 = vadd.f32 %v2188_v23, %v241_v17 }
  0xb8   :  { %308 = vst.msk [vmem:[#allocation2 + $0xa8] sm:$0xff] %vm286_vm1, %v259_v14 }
  0xb9   :  { %316 = vst.msk [vmem:[#allocation2 + $0xe8] sm:$0xff] %vm286_vm1, %v279_v15 }
  0xba   :  { %293 = vst.msk [vmem:[#allocation2 + $0x30] sm:$0xff] %vm286_vm1, %v222_v18 }
  0xbb   :  { %301 = vst.msk [vmem:[#allocation2 + $0x70] sm:$0xff] %vm286_vm1, %v242_v19 }
  0xbd   :  { %v261_v20 = vpop.f32.mrf.mxu2  ;;  %v281_v21 = vpop.f32.mrf.mxu3 }
  0xbe   :  { %v262_v24 = vadd.f32 %v2188_v23, %v261_v20  ;;  %v282_v25 = vadd.f32 %v2188_v23, %v281_v21  ;;  %v223_v26 = vpop.f32.mrf.mxu0  ;;  %v243_v27 = vpop.f32.mrf.mxu1 }
  0xbf   :  { %v224_v28 = vadd.f32 %v2188_v23, %v223_v26  ;;  %v244_v29 = vadd.f32 %v2188_v23, %v243_v27 }
  0xc0   :  { %309 = vst.msk [vmem:[#allocation2 + $0xb0] sm:$0xff] %vm286_vm1, %v262_v24 }
  0xc1   :  { %317 = vst.msk [vmem:[#allocation2 + $0xf0] sm:$0xff] %vm286_vm1, %v282_v25 }
  0xc2   :  { %294 = vst.msk [vmem:[#allocation2 + $0x38] sm:$0xff] %vm286_vm1, %v224_v28 }
  0xc3   :  { %302 = vst.msk [vmem:[#allocation2 + $0x78] sm:$0xff] %vm286_vm1, %v244_v29 }
  0xc5   :  { %v263_v30 = vpop.f32.mrf.mxu2  ;;  %v283_v31 = vpop.f32.mrf.mxu3 }
  0xc6   :  { %v264_v32 = vadd.f32 %v2188_v23, %v263_v30  ;;  %v284_v33 = vadd.f32 %v2188_v23, %v283_v31 }
  0xc8   :  { %310 = vst.msk [vmem:[#allocation2 + $0xb8] sm:$0xff] %vm286_vm1, %v264_v32 }
  0xc9   :  { %318 = vst.msk [vmem:[#allocation2 + $0xf8] sm:$0xff] %vm286_vm1, %v284_v33 }
  0xca LB: > { %v1618_v23 = vor.u32 %v2111_v4, %v2106_v3  ;;  %v358_v35 = vpack.c.bf16 %v2046_v34, %v2046_v34  ;;  %v1614_v36 = vor.u32 %v2101_v2, %v2096_v1  ;;  %s2060_s11 = smov 96   ;;  %v359_v38 = vperm.slane %v2183_v22, 0  ;;  %s2061_s12 = smov 64   ;;  %s2050_s0 = sphi %s2268_s0, %s340_s0   ;;  %v2046_v34 = vphi %v2266_v34, %v429_v34  }
  0xcb   : > { %s343_s13 = ssub.s32 0, %s2050_s0  ;;  %p342_p0 = scmp.lt.s32.totalorder %s2050_s0, 0  ;;  %vm435_vm15 = vcmask 130048   ;;  %vm438_vm2 = vcmask 261248  }
  0xcc   : > { %384 = vmatpush.bf16.msra.mxu0 %v1618_v23  ;;  %361 = vrot.lane.b32.xlu0 %v358_v35, %s2060_s11  ;;  %s1607_s14 = smin.u32 %s2050_s0, %s343_s13  ;;  %s348_s17 = sadd.s32 7, %s2050_s0 }
  0xcd   : > { %s345_s15 = sand.u32 7, %s1607_s14   ;;  %s1609_s20 = sshll.u32 %s2050_s0, 3 }
  0xce   : > { %s346_s16 = ssub.s32 0, %s345_s15  ;;  %s353_s22 = scalar_lea.vmem [#allocation2], %s1609_s20 }
  0xcf   : > { %s2807_s16 = smov (!%p342_p0, %s346_s16), %s345_s15  ;;  %s434_s24 = scalar_lea.vmem [#allocation3], %s1609_s20 }
  0xd0   : > { %385 = vmatpush.bf16.msra.mxu0 %v1614_v36  ;;  %s1608_s18 = sshll.u32 %s2807_s16, 1  ;;  %v354_v42 = vld [vmem:[%s353_s22] sm:$0xff]  ;;  %s340_s0 = sadd.s32 1, %s2050_s0  }
  0xd1   : > { %s2290_s19 = ssub.s32 %s348_s17, %s1608_s18  ;;  %p337_p1 = scmp.ge.s32.totalorder %s340_s0, 32  }
  0xd2   : > { %s1610_s21 = sshll.u32 %s2290_s19, 3  ;;  %v1711_v11 = vld [vmem:[%s2795_s1 + $0x28] sm:$0xff] (%p337_p1)  ;;  %v1710_v12 = vld [vmem:[%s2795_s1 + $0x20] sm:$0xff] (%p337_p1) }
  0xd3   : > { %s355_s23 = scalar_lea.vmem [#allocation2], %s1610_s21  ;;  %s437_s25 = scalar_lea.vmem [#allocation3], %s1610_s21  ;;  %1727 = vmatpush.bf16.msra.mxu3 (%p337_p1), %v1711_v11  ;;  %1726 = vmatpush.bf16.msra.mxu1 (%p337_p1), %v1711_v11 }
  0xd4   : > { %v356_v43 = vld [vmem:[%s355_s23] sm:$0xff] }
  0xd5   : > { %v357_v44 = vsel %vm334_vm10, %v354_v42, %v356_v43 }
  0xd7   :  { %1729 = vmatpush.bf16.msra.mxu3 (%p337_p1), %v1710_v12  ;;  %1728 = vmatpush.bf16.msra.mxu1 (%p337_p1), %v1710_v12 }
 0x13e   : > { %v362_v37 = vpop.permute.xlu0 %361 }
 0x13f   : > { %1619 = vmatmul.msk.bf16.vlgmr.msra.gmra.mxu0 %vm148_vm0, %v362_v37 }
 0x140   :  { %569 = vmatpush.bf16.msra.mxu0 (%p337_p1), %v1711_v11 }
 0x144   :  { %570 = vmatpush.bf16.msra.mxu0 (%p337_p1), %v1710_v12 }
 0x1bc   : > { %v387_v39 = vpop.f32.mrf.mxu0 }
 0x1bd   : > { %v388_v40 = vadd.f32 %v387_v39, %v359_v38 }
 0x1bf   : > { %412 = vrot.lane.b32.xlu0 %v388_v40, %s2061_s12  ;;  %v391_v45 = vadd.f32 %v388_v40, %v357_v44 }
 0x1c1   : > { %v1620_v46 = vmul.f32 -1.442695, %v391_v45 }
 0x1c3   : > { %1770 = vpow2.f32 %v1620_v46 }
 0x1c4   : > { %v389_v41 = vpop.f32.mrf.mxu0 }
 0x1c9   : > { %v1771_v47 = vpop.eup %1770 }
 0x1ca   : > { %v395_v48 = vadd.f32 1.0, %v1771_v47 }
 0x1cc   : > { %1772 = vrcp.f32 %v395_v48  ;;  %v407_v54 = vand.u32 2147483648, %v395_v48  ;;  %vm401_vm12 = vweird.f32 %v395_v48  ;;  %v405_v55 = vand.u32 2147483647, %v395_v48 }
 0x1ce   : > { %v408_v57 = vor.u32 1.1754944e-38, %v407_v54  ;;  %vm406_vm14 = vcmp.eq.f32.partialorder %v405_v55, 8.507059e+37 }
 0x1d2   : > { %v1773_v49 = vpop.eup %1772 }
 0x1d3   : > { %v397_v50 = vmul.f32 %v1773_v49, %v395_v48  ;;  %vm402_vm11 = vweird.f32 %v1773_v49 }
 0x1d4   : > { %vm403_vm13 = vmor %vm401_vm12, %vm402_vm11 }
 0x1d5   : > { %v398_v51 = vsub.f32 1.0, %v397_v50 }
 0x1d7   : > { %v399_v52 = vmul.f32 %v1773_v49, %v398_v51 }
 0x1d9   : > { %v400_v53 = vadd.f32 %v1773_v49, %v399_v52 }
 0x1db   : > { %v404_v56 = vsel %vm403_vm13, %v1773_v49, %v400_v53 }
 0x1dc   : > { %v409_v59 = vsel %vm406_vm14, %v408_v57, %v404_v56 }
 0x1dd   : > { %v422_v6 = vsub.f32 1.0, %v409_v59  ;;  %v428_v9 = vmul.f32 %v2046_v34, %v409_v59 }
 0x231   : > { %v413_v58 = vpop.permute.xlu0 %412 }
 0x232   : > { %v415_v60 = vmul.f32 %v413_v58, %v409_v59 }
 0x234   : > { %417 = vrot.lane.b32.xlu1 %v415_v60, %s2061_s12 }
 0x2a6   : > { %v418_v61 = vpop.permute.xlu1 %417 }
 0x2a7   : > { %v420_v0 = vadd.f32 %v418_v61, %v357_v44 }
 0x2a9   : > { %1774 = vtanh.f32 %v420_v0 }
 0x2af   : > { %v1775_v5 = vpop.eup %1774 }
 0x2b0   : > { %424 = vrot.lane.b32.xlu1 %v1775_v5, %s2060_s11 }
 0x322   : > { %v425_v7 = vpop.permute.xlu1 %424 }
 0x323   : > { %v427_v8 = vmul.f32 %v425_v7, %v422_v6 }
 0x325   : > { %v429_v34 = vadd.f32 %v428_v9, %v427_v8  }
 0x327   : > { %431 = vrot.lane.b32.xlu2 %v429_v34, %s2060_s11  ;;  %s2695_s11 = smov (%p337_p1), 0  }
 0x37f   :  { %339 = sbr.rel (!%p337_p1) target bundleno = 202 (0xca), region = 58 }
 0x381   : > { %v432_v10 = vpop.permute.xlu2 %431 }
 0x382   : > { %436 = vst.msk [vmem:[%s434_s24] sm:$0xff] %vm435_vm15, %v432_v10 }
 0x383   : > { %439 = vst.msk [vmem:[%s437_s25] sm:$0xff] %vm438_vm2, %v432_v10  ;;  %v2430_v10 = vld [vmem:[%s2799_s2 + $0x10] ss:$0 sm:$0xff] (%p337_p1) }
 0x38a   :  { %v2324_v13 = vld [vmem:[#allocation3] sm:$0xff]  ;;  %v2326_v14 = vld [vmem:[#allocation3 + $0x8] sm:$0xff]  ;;  %v462_v1 = vld [vmem:[#allocation3 + $0xb0] sm:$0xff] }
 0x38b   :  { %v486_v15 = vpack.c.bf16 %v2326_v14, %v2324_v13  ;;  %v463_v2 = vld [vmem:[#allocation3 + $0xb8] sm:$0xff]  ;;  %v2332_v4 = vld [vmem:[#allocation3 + $0x10] sm:$0xff]  ;;  %v464_v17 = vld [vmem:[#allocation3 + $0xc0] sm:$0xff] }
 0x38c   :  { %v497_v3 = vpack.c.bf16 %v463_v2, %v462_v1  ;;  %v2334_v22 = vld [vmem:[#allocation3 + $0x18] sm:$0xff]  ;;  %v465_v18 = vld [vmem:[#allocation3 + $0xc8] sm:$0xff]  ;;  %v2340_v20 = vld [vmem:[#allocation3 + $0x20] sm:$0xff] }
 0x38d   :  { %1629 = vmatmul.msk.bf16.vlgmr.msra.gmra.mxu0 %vm148_vm0, %v486_v15  ;;  %v487_v16 = vpack.c.bf16 %v2334_v22, %v2332_v4  ;;  %v498_v19 = vpack.c.bf16 %v465_v18, %v464_v17  ;;  %v2342_v21 = vld [vmem:[#allocation3 + $0x28] sm:$0xff]  ;;  %v2347_v25 = vld [vmem:[#allocation3 + $0xd0] sm:$0xff]  ;;  %v2349_v26 = vld [vmem:[#allocation3 + $0xd8] sm:$0xff] }
 0x38e   :  { %1640 = vmatmul.msk.bf16.vlgmr.msra.gmra.mxu3 %vm148_vm0, %v497_v3  ;;  %v488_v24 = vpack.c.bf16 %v2342_v21, %v2340_v20  ;;  %v499_v27 = vpack.c.bf16 %v2349_v26, %v2347_v25  ;;  %v2354_v28 = vld [vmem:[#allocation3 + $0x30] sm:$0xff]  ;;  %v2356_v29 = vld [vmem:[#allocation3 + $0x38] sm:$0xff]  ;;  %v2361_v31 = vld [vmem:[#allocation3 + $0xe0] sm:$0xff] }
 0x38f   :  { %v489_v30 = vpack.c.bf16 %v2356_v29, %v2354_v28  ;;  %v2363_v32 = vld [vmem:[#allocation3 + $0xe8] sm:$0xff]  ;;  %v2368_v34 = vld [vmem:[#allocation3 + $0x40] sm:$0xff]  ;;  %v2375_v36 = vld [vmem:[#allocation3 + $0xf0] sm:$0xff] }
 0x390   :  { %v500_v33 = vpack.c.bf16 %v2363_v32, %v2361_v31  ;;  %v2370_v23 = vld [vmem:[#allocation3 + $0x48] sm:$0xff]  ;;  %v2377_v37 = vld [vmem:[#allocation3 + $0xf8] sm:$0xff]  ;;  %v456_v39 = vld [vmem:[#allocation3 + $0x80] sm:$0xff] }
 0x391   :  { %v490_v35 = vpack.c.bf16 %v2370_v23, %v2368_v34  ;;  %v501_v38 = vpack.c.bf16 %v2377_v37, %v2375_v36  ;;  %v457_v40 = vld [vmem:[#allocation3 + $0x88] sm:$0xff]  ;;  %v2383_v42 = vld [vmem:[#allocation3 + $0x50] sm:$0xff]  ;;  %v2385_v43 = vld [vmem:[#allocation3 + $0x58] sm:$0xff] }
 0x392   :  { %v494_v41 = vpack.c.bf16 %v457_v40, %v456_v39  ;;  %v491_v44 = vpack.c.bf16 %v2385_v43, %v2383_v42  ;;  %v458_v45 = vld [vmem:[#allocation3 + $0x90] sm:$0xff]  ;;  %v459_v46 = vld [vmem:[#allocation3 + $0x98] sm:$0xff]  ;;  %v2391_v48 = vld [vmem:[#allocation3 + $0x60] sm:$0xff] }
 0x393   :  { %v495_v47 = vpack.c.bf16 %v459_v46, %v458_v45  ;;  %v2393_v49 = vld [vmem:[#allocation3 + $0x68] sm:$0xff]  ;;  %v460_v51 = vld [vmem:[#allocation3 + $0xa0] sm:$0xff]  ;;  %v2402_v54 = vld [vmem:[#allocation3 + $0x70] sm:$0xff] }
 0x394   :  { %1637 = vmatmul.msk.bf16.vlgmr.msra.gmra.mxu1 %vm148_vm0, %v494_v41  ;;  %v492_v50 = vpack.c.bf16 %v2393_v49, %v2391_v48  ;;  %v2398_v52 = vld [vmem:[#allocation3 + $0xa8] sm:$0xff]  ;;  %v2404_v55 = vld [vmem:[#allocation3 + $0x78] sm:$0xff] }
 0x395   :  { %v496_v53 = vpack.c.bf16 %v2398_v52, %v460_v51  ;;  %v493_v56 = vpack.c.bf16 %v2404_v55, %v2402_v54  ;;  %v2438_v2 = vld [vmem:[%s2799_s2 + $0x18] ss:$0 sm:$0xff] }
 0x39d   :  { %1630 = vmatmul.msk.bf16.gmra.mxu0 %vm148_vm0, %v487_v16 }
 0x39e   :  { %1641 = vmatmul.msk.bf16.gmra.mxu3 %vm148_vm0, %v498_v19 }
 0x3a4   :  { %1638 = vmatmul.msk.bf16.gmra.mxu1 %vm148_vm0, %v495_v47 }
 0x3ad   :  { %1631 = vmatmul.msk.bf16.gmra.mxu0 %vm148_vm0, %v488_v24 }
 0x3ae   :  { %1642 = vmatmul.msk.bf16.gmra.mxu3 %vm148_vm0, %v499_v27 }
 0x3b4   :  { %1639 = vmatmul.msk.bf16.gmra.mxu1 %vm148_vm0, %v496_v53 }
 0x3bd   :  { %1632 = vmatmul.msk.bf16.gmra.mxu0 %vm148_vm0, %v489_v30 }
 0x3be   :  { %1643 = vmatmul.msk.bf16.gmra.mxu3 %vm148_vm0, %v500_v33 }
 0x3cd   :  { %1633 = vmatmul.msk.bf16.gmra.mxu0 %vm148_vm0, %v490_v35 }
 0x3ce   :  { %1644 = vmatmul.msk.bf16.gmra.mxu3 %vm148_vm0, %v501_v38 }
 0x3dd   :  { %1634 = vmatmul.msk.bf16.gmra.mxu0 %vm148_vm0, %v491_v44 }
 0x3ed   :  { %1635 = vmatmul.msk.bf16.gmra.mxu0 %vm148_vm0, %v492_v50 }
 0x3fd   :  { %1636 = vmatmul.msk.bf16.gmra.mxu0 %vm148_vm0, %v493_v56 }
 0x40a   :  { %v2409_v57 = vpop.f32.mrf.mxu0 }
 0x411   :  { %v2413_v60 = vpop.f32.mrf.mxu3  ;;  %v2446_v38 = vpop.f32.mrf.mxu1 }
 0x412   :  { %v574_v58 = vpop.f32.mrf.mxu0 }
 0x419   :  { %v2417_v5 = vpop.f32.mrf.mxu3  ;;  %v2453_v47 = vpop.f32.mrf.mxu1 }
 0x41a   :  { %v2411_v59 = vpop.f32.mrf.mxu0 }
 0x421   :  { %v2421_v7 = vpop.f32.mrf.mxu3 }
 0x422   :  { %v2415_v61 = vpop.f32.mrf.mxu0 }
 0x429   :  { %v2425_v9 = vpop.f32.mrf.mxu3 }
 0x42a   :  { %v582_v0 = vpop.f32.mrf.mxu0 }
 0x431   :  { %v2433_v15 = vpop.f32.mrf.mxu3 }
 0x432   :  { %v2419_v6 = vpop.f32.mrf.mxu0 }
 0x439   :  { %v639_v30 = vpop.f32.mrf.mxu3 }
 0x43a   :  { %v2423_v8 = vpop.f32.mrf.mxu0 }
 0x441   :  { %v2450_v45 = vpop.f32.mrf.mxu3 }
 0x442   :  { %v589_v11 = vpop.f32.mrf.mxu0 }
 0x443   :  { %v590_v12 = vadd.f32 %v2430_v10, %v589_v11  ;;  %v583_v11 = vadd.f32 %v2430_v10, %v582_v0 }
 0x445   :  { %1782 = vtanh.f32 %v590_v12 }
 0x44a   :  { %v592_v1 = vpop.f32.mrf.mxu0 }
 0x44b   :  { %v1783_v3 = vpop.eup %1782  ;;  %v593_v16 = vadd.f32 %v2430_v10, %v592_v1  ;;  %v2459_v1 = vpop.f32.mrf.mxu3 }
 0x44c   :  { %v692_v17 = vmul.f32 %v1783_v3, %v2438_v2 }
 0x44d   :  { %1784 = vtanh.f32 %v593_v16 }
 0x44e   :  { %v738_v18 = vsel %vm148_vm0, %v692_v17, 0.0 }
 0x44f   :  { %739 = vadd.xlane.f32.xlu2 %v738_v18  ;;  %v2462_v18 = vpop.f32.mrf.mxu1 }
 0x452   :  { %v594_v19 = vpop.f32.mrf.mxu0 }
 0x453   :  { %v1785_v24 = vpop.eup %1784  ;;  %v595_v27 = vadd.f32 %v2430_v10, %v594_v19 }
 0x454   :  { %v693_v33 = vmul.f32 %v1785_v24, %v2438_v2  ;;  %v575_v24 = vadd.f32 %v2430_v10, %v574_v58  ;;  %v585_v58 = vadd.f32 %v2430_v10, %v2419_v6 }
 0x455   :  { %1786 = vtanh.f32 %v595_v27 }
 0x456   :  { %v741_v35 = vsel %vm148_vm0, %v693_v33, 0.0  ;;  %v647_v33 = vpop.f32.mrf.mxu3 }
 0x457   :  { %742 = vadd.xlane.f32.xlu1 %v741_v35 }
 0x45a   :  { %v597_v39 = vpop.f32.mrf.mxu0 }
 0x45b   :  { %v1787_v40 = vpop.eup %1786  ;;  %v598_v41 = vadd.f32 %v2430_v10, %v597_v39 }
 0x45c   :  { %v694_v44 = vmul.f32 %v1787_v40, %v2438_v2 }
 0x45d   :  { %1788 = vtanh.f32 %v598_v41 }
 0x45e   :  { %v744_v46 = vsel %vm148_vm0, %v694_v44, 0.0 }
 0x45f   :  { %745 = vadd.xlane.f32.xlu0 %v744_v46  ;;  %v648_v46 = vadd.f32 %v2430_v10, %v647_v33 }
 0x462   :  { %v599_v50 = vpop.f32.mrf.mxu0 }
 0x463   :  { %v1789_v51 = vpop.eup %1788  ;;  %v600_v53 = vadd.f32 %v2430_v10, %v599_v50  ;;  %v2473_v50 = vpop.f32.mrf.mxu1 }
 0x464   :  { %v695_v56 = vmul.f32 %v1789_v51, %v2438_v2 }
 0x465   :  { %1790 = vtanh.f32 %v600_v53 }
 0x466   :  { %v747_v12 = vsel %vm148_vm0, %v695_v56, 0.0  ;;  %1792 = vtanh.f32 %v583_v11 }
 0x467   :  { %748 = vadd.xlane.f32.xlu2 %v747_v12 }
 0x46a   :  { %v602_v3 = vpop.f32.mrf.mxu0 }
 0x46b   :  { %v1791_v16 = vpop.eup %1790  ;;  %v603_v17 = vadd.f32 %v2430_v10, %v602_v3 }
 0x46c   :  { %v696_v19 = vmul.f32 %v1791_v16, %v2438_v2  ;;  %v1793_v27 = vpop.eup %1792 }
 0x46d   :  { %1794 = vtanh.f32 %v603_v17  ;;  %v689_v39 = vmul.f32 %v1793_v27, %v2438_v2  ;;  %v578_v17 = vadd.f32 %v2430_v10, %v2411_v59 }
 0x46e   :  { %v750_v0 = vsel %vm148_vm0, %v696_v19, 0.0  ;;  %1796 = vtanh.f32 %v575_v24  ;;  %v640_v24 = vadd.f32 %v2430_v10, %v639_v30 }
 0x46f   :  { %751 = vadd.xlane.f32.xlu2 %v750_v0  ;;  %v729_v53 = vsel %vm148_vm0, %v689_v39, 0.0  ;;  %v649_v39 = vpop.f32.mrf.mxu3 }
 0x472   :  { %v604_v35 = vpop.f32.mrf.mxu0 }
 0x473   :  { %v1795_v40 = vpop.eup %1794  ;;  %v605_v41 = vadd.f32 %v2430_v10, %v604_v35  ;;  %v2485_v35 = vpop.f32.mrf.mxu1 }
 0x474   :  { %v697_v44 = vmul.f32 %v1795_v40, %v2438_v2  ;;  %v1797_v56 = vpop.eup %1796 }
 0x475   :  { %1798 = vtanh.f32 %v605_v41  ;;  %v686_v12 = vmul.f32 %v1797_v56, %v2438_v2  ;;  %v633_v56 = vadd.f32 %v2430_v10, %v2421_v7 }
 0x476   :  { %v753_v51 = vsel %vm148_vm0, %v697_v44, 0.0  ;;  %1800 = vtanh.f32 %v648_v46  ;;  %v650_v46 = vadd.f32 %v2430_v10, %v649_v39 }
 0x477   :  { %754 = vadd.xlane.f32.xlu1 %v753_v51  ;;  %730 = vadd.xlane.f32.xlu2 %v729_v53  ;;  %1802 = vtanh.f32 %v585_v58  ;;  %v720_v27 = vsel %vm148_vm0, %v686_v12, 0.0  ;;  %v588_v51 = vadd.f32 %v2430_v10, %v2423_v8 }
 0x47a   :  { %v607_v11 = vpop.f32.mrf.mxu0 }
 0x47b   :  { %v1799_v3 = vpop.eup %1798  ;;  %v608_v16 = vadd.f32 %v2430_v10, %v607_v11 }
 0x47c   :  { %v698_v6 = vmul.f32 %v1799_v3, %v2438_v2  ;;  %v1801_v19 = vpop.eup %1800 }
 0x47d   :  { %1804 = vtanh.f32 %v608_v16  ;;  %v1803_v33 = vpop.eup %1802  ;;  %v715_v40 = vmul.f32 %v1801_v19, %v2438_v2  ;;  %v580_v19 = vadd.f32 %v2430_v10, %v2415_v61 }
 0x47e   :  { %v756_v0 = vsel %vm148_vm0, %v698_v6, 0.0  ;;  %1806 = vtanh.f32 %v578_v17  ;;  %v690_v59 = vmul.f32 %v1803_v33, %v2438_v2  ;;  %v624_v6 = vpop.f32.mrf.mxu1  ;;  %v643_v33 = vadd.f32 %v2430_v10, %v2450_v45 }
 0x47f   :  { %757 = vadd.xlane.f32.xlu1 %v756_v0  ;;  %721 = vadd.xlane.f32.xlu2 %v720_v27  ;;  %1808 = vtanh.f32 %v640_v24  ;;  %v807_v53 = vsel %vm148_vm0, %v715_v40, 0.0  ;;  %v625_v0 = vadd.f32 %v2430_v10, %v624_v6  ;;  %v573_v45 = vadd.f32 %v2430_v10, %v2409_v57 }
 0x480   :  { %v732_v12 = vsel %vm148_vm0, %v690_v59, 0.0 }
 0x482   :  { %v609_v41 = vpop.f32.mrf.mxu0 }
 0x483   :  { %v1805_v44 = vpop.eup %1804  ;;  %v610_v30 = vadd.f32 %v2430_v10, %v609_v41 }
 0x484   :  { %v699_v58 = vmul.f32 %v1805_v44, %v2438_v2  ;;  %v1807_v3 = vpop.eup %1806 }
 0x485   :  { %1810 = vtanh.f32 %v610_v30  ;;  %v1809_v16 = vpop.eup %1808  ;;  %v687_v8 = vmul.f32 %v1807_v3, %v2438_v2 }
 0x486   :  { %v759_v11 = vsel %vm148_vm0, %v699_v58, 0.0  ;;  %1812 = vtanh.f32 %v650_v46  ;;  %v712_v7 = vmul.f32 %v1809_v16, %v2438_v2  ;;  %v618_v58 = vadd.f32 %v2430_v10, %v2462_v18 }
 0x487   :  { %760 = vadd.xlane.f32.xlu0 %v759_v11  ;;  %733 = vadd.xlane.f32.xlu1 %v732_v12  ;;  %1814 = vtanh.f32 %v588_v51  ;;  %v723_v40 = vsel %vm148_vm0, %v687_v8, 0.0 }
 0x488   :  { %808 = vadd.xlane.f32.xlu2 %v807_v53  ;;  %1816 = vtanh.f32 %v633_v56  ;;  %v798_v61 = vsel %vm148_vm0, %v712_v7, 0.0  ;;  %v635_v56 = vadd.f32 %v2430_v10, %v2425_v9  ;;  %v628_v9 = vadd.f32 %v2430_v10, %v2413_v60 }
 0x489   :  { %1818 = vtanh.f32 %v580_v19 }
 0x48a   :  { %1820 = vtanh.f32 %v625_v0 }
 0x48b   :  { %v1811_v17 = vpop.eup %1810  ;;  %1822 = vtanh.f32 %v643_v33 }
 0x48c   :  { %v700_v24 = vmul.f32 %v1811_v17, %v2438_v2  ;;  %v1813_v27 = vpop.eup %1812  ;;  %1824 = vtanh.f32 %v573_v45  ;;  %v645_v17 = vadd.f32 %v2430_v10, %v2459_v1  ;;  %v638_v1 = vadd.f32 %v2430_v10, %v2433_v15 }
 0x48d   :  { %v1815_v41 = vpop.eup %1814  ;;  %v716_v44 = vmul.f32 %v1813_v27, %v2438_v2  ;;  %1826 = vtanh.f32 %v618_v58 }
 0x48e   :  { %v762_v39 = vsel %vm148_vm0, %v700_v24, 0.0  ;;  %v1817_v59 = vpop.eup %1816  ;;  %v691_v30 = vmul.f32 %v1815_v41, %v2438_v2  ;;  %1828 = vtanh.f32 %v635_v56 }
 0x48f   :  { %763 = vadd.xlane.f32.xlu0 %v762_v39  ;;  %724 = vadd.xlane.f32.xlu1 %v723_v40  ;;  %v709_v46 = vmul.f32 %v1817_v59, %v2438_v2  ;;  %v810_v51 = vsel %vm148_vm0, %v716_v44, 0.0  ;;  %v1819_v53 = vpop.eup %1818  ;;  %1830 = vtanh.f32 %v628_v9  ;;  %v620_v40 = vadd.f32 %v2430_v10, %v2473_v50 }
 0x490   :  { %799 = vadd.xlane.f32.xlu2 %v798_v61  ;;  %v1821_v11 = vpop.eup %1820  ;;  %v735_v12 = vsel %vm148_vm0, %v691_v30, 0.0  ;;  %v688_v16 = vmul.f32 %v1819_v53, %v2438_v2  ;;  %1832 = vtanh.f32 %v645_v17  ;;  %v630_v50 = vadd.f32 %v2430_v10, %v2417_v5 }
 0x491   :  { %v1823_v3 = vpop.eup %1822  ;;  %v789_v57 = vsel %vm148_vm0, %v709_v46, 0.0  ;;  %v706_v18 = vmul.f32 %v1821_v11, %v2438_v2  ;;  %1834 = vtanh.f32 %v638_v1  ;;  %v613_v46 = vadd.f32 %v2430_v10, %v2446_v38 }
 0x492   :  { %v713_v6 = vmul.f32 %v1823_v3, %v2438_v2  ;;  %v1825_v8 = vpop.eup %1824  ;;  %v726_v24 = vsel %vm148_vm0, %v688_v16, 0.0  ;;  %1836 = vtanh.f32 %v620_v40  ;;  %v623_v5 = vadd.f32 %v2430_v10, %v2485_v35 }
 0x493   :  { %v780_v19 = vsel %vm148_vm0, %v706_v18, 0.0  ;;  %v1827_v7 = vpop.eup %1826  ;;  %v685_v39 = vmul.f32 %v1825_v8, %v2438_v2  ;;  %1838 = vtanh.f32 %v630_v50  ;;  %v615_v9 = vadd.f32 %v2430_v10, %v2453_v47 }
 0x494   :  { %v801_v0 = vsel %vm148_vm0, %v713_v6, 0.0  ;;  %v1829_v27 = vpop.eup %1828  ;;  %v703_v33 = vmul.f32 %v1827_v7, %v2438_v2  ;;  %1840 = vtanh.f32 %v613_v46 }
 0x495   :  { %v710_v60 = vmul.f32 %v1829_v27, %v2438_v2  ;;  %v1831_v61 = vpop.eup %1830  ;;  %v717_v44 = vsel %vm148_vm0, %v685_v39, 0.0  ;;  %1842 = vtanh.f32 %v623_v5 }
 0x496   :  { %v771_v41 = vsel %vm148_vm0, %v703_v33, 0.0  ;;  %v1833_v30 = vpop.eup %1832  ;;  %v707_v45 = vmul.f32 %v1831_v61, %v2438_v2  ;;  %1844 = vtanh.f32 %v615_v9 }
 0x497   :  { %736 = vadd.xlane.f32.xlu0 %v735_v12  ;;  %811 = vadd.xlane.f32.xlu1 %v810_v51  ;;  %v792_v59 = vsel %vm148_vm0, %v710_v60, 0.0  ;;  %v714_v15 = vmul.f32 %v1833_v30, %v2438_v2  ;;  %v1835_v58 = vpop.eup %1834 }
 0x498   :  { %790 = vadd.xlane.f32.xlu2 %v789_v57  ;;  %v783_v51 = vsel %vm148_vm0, %v707_v45, 0.0  ;;  %v1837_v56 = vpop.eup %1836  ;;  %v711_v12 = vmul.f32 %v1835_v58, %v2438_v2 }
 0x499   :  { %v804_v53 = vsel %vm148_vm0, %v714_v15, 0.0  ;;  %v704_v11 = vmul.f32 %v1837_v56, %v2438_v2  ;;  %v1839_v3 = vpop.eup %1838 }
 0x49a   :  { %v795_v57 = vsel %vm148_vm0, %v711_v12, 0.0  ;;  %v1841_v18 = vpop.eup %1840  ;;  %v708_v6 = vmul.f32 %v1839_v3, %v2438_v2 }
 0x49b   :  { %v774_v38 = vsel %vm148_vm0, %v704_v11, 0.0  ;;  %v701_v16 = vmul.f32 %v1841_v18, %v2438_v2  ;;  %v1843_v17 = vpop.eup %1842 }
 0x49c   :  { %v786_v35 = vsel %vm148_vm0, %v708_v6, 0.0 }
 0x49d   :  { %v765_v8 = vsel %vm148_vm0, %v701_v16, 0.0 }
 0x49f   :  { %727 = vadd.xlane.f32.xlu0 %v726_v24  ;;  %802 = vadd.xlane.f32.xlu1 %v801_v0  ;;  %v1845_v24 = vpop.eup %1844 }
 0x4a0   :  { %781 = vadd.xlane.f32.xlu2 %v780_v19  ;;  %v705_v19 = vmul.f32 %v1843_v17, %v2438_v2  ;;  %v702_v0 = vmul.f32 %v1845_v24, %v2438_v2 }
 0x4a2   :  { %v777_v7 = vsel %vm148_vm0, %v705_v19, 0.0  ;;  %v768_v27 = vsel %vm148_vm0, %v702_v0, 0.0 }
 0x4a7   :  { %793 = vadd.xlane.f32.xlu1 %v792_v59  ;;  %718 = vadd.xlane.f32.xlu0 %v717_v44 }
 0x4a8   :  { %772 = vadd.xlane.f32.xlu2 %v771_v41 }
 0x4af   :  { %784 = vadd.xlane.f32.xlu1 %v783_v51  ;;  %805 = vadd.xlane.f32.xlu0 %v804_v53 }
 0x4b7   :  { %775 = vadd.xlane.f32.xlu1 %v774_v38  ;;  %796 = vadd.xlane.f32.xlu0 %v795_v57 }
 0x4bf   :  { %766 = vadd.xlane.f32.xlu1 %v765_v8  ;;  %787 = vadd.xlane.f32.xlu0 %v786_v35 }
 0x4c2   :  { %v740_v10 = vpop.xlane.xlu2 %739 }
 0x4c7   :  { %778 = vadd.xlane.f32.xlu0 %v777_v7 }
 0x4ca   :  { %v743_v33 = vpop.xlane.xlu1 %742 }
 0x4cf   :  { %769 = vadd.xlane.f32.xlu0 %v768_v27 }
 0x4d2   :  { %v746_v1 = vpop.xlane.xlu0 %745 }
 0x4d3   :  { %1846 = vtanh.f32 %v746_v1 }
 0x4d9   :  { %v1847_v30 = vpop.eup %1846 }
 0x4da   :  { %v749_v47 = vpop.xlane.xlu2 %748  ;;  %v863_v58 = vmul.f32 1.442695, %v1847_v30 }
 0x4db   :  { %1848 = vtanh.f32 %v749_v47 }
 0x4e1   :  { %v1849_v2 = vpop.eup %1848 }
 0x4e2   :  { %v752_v60 = vpop.xlane.xlu2 %751  ;;  %v865_v51 = vmul.f32 1.442695, %v1849_v2 }
 0x4e3   :  { %1850 = vtanh.f32 %v752_v60 }
 0x4e9   :  { %v1851_v50 = vpop.eup %1850 }
 0x4ea   :  { %v755_v39 = vpop.xlane.xlu1 %754  ;;  %v731_v40 = vpop.xlane.xlu2 %730  ;;  %v867_v53 = vmul.f32 1.442695, %v1851_v50 }
 0x4f2   :  { %v758_v41 = vpop.xlane.xlu1 %757  ;;  %v722_v44 = vpop.xlane.xlu2 %721 }
 0x4fa   :  { %v761_v61 = vpop.xlane.xlu0 %760  ;;  %v734_v59 = vpop.xlane.xlu1 %733 }
 0x4fb   :  { %1852 = vtanh.f32 %v761_v61  ;;  %v809_v56 = vpop.xlane.xlu2 %808 }
 0x4fc   :  { %1854 = vtanh.f32 %v758_v41 }
 0x4fd   :  { %1856 = vtanh.f32 %v755_v39 }
 0x501   :  { %v1853_v46 = vpop.eup %1852 }
 0x502   :  { %v764_v45 = vpop.xlane.xlu0 %763  ;;  %v725_v15 = vpop.xlane.xlu1 %724  ;;  %v873_v12 = vmul.f32 1.442695, %v1853_v46 }
 0x503   :  { %1858 = vtanh.f32 %v764_v45  ;;  %v1855_v11 = vpop.eup %1854 }
 0x504   :  { %1860 = vtanh.f32 %v740_v10  ;;  %v1857_v5 = vpop.eup %1856  ;;  %v871_v38 = vmul.f32 1.442695, %v1855_v11 }
 0x505   :  { %1862 = vtanh.f32 %v743_v33  ;;  %v869_v8 = vmul.f32 1.442695, %v1857_v5 }
 0x506   :  { %1864 = vtanh.f32 %v809_v56 }
 0x507   :  { %1866 = vpow2.f32 %v863_v58 }
 0x508   :  { %1868 = vpow2.f32 %v865_v51  ;;  %v800_v51 = vpop.xlane.xlu2 %799 }
 0x509   :  { %v1859_v3 = vpop.eup %1858  ;;  %1870 = vpow2.f32 %v867_v53 }
 0x50a   :  { %v875_v57 = vmul.f32 1.442695, %v1859_v3  ;;  %v737_v18 = vpop.xlane.xlu0 %736  ;;  %v812_v16 = vpop.xlane.xlu1 %811  ;;  %1872 = vpow2.f32 %v873_v12 }
 0x50b   :  { %v1861_v6 = vpop.eup %1860 }
 0x50c   :  { %v1863_v9 = vpop.eup %1862  ;;  %1874 = vpow2.f32 %v875_v57  ;;  %v859_v2 = vmul.f32 1.442695, %v1861_v6 }
 0x50d   :  { %v1865_v35 = vpop.eup %1864  ;;  %1876 = vtanh.f32 %v812_v16  ;;  %v861_v1 = vmul.f32 1.442695, %v1863_v9 }
 0x50e   :  { %v2566_v17 = vpop.eup %1866  ;;  %1878 = vpow2.f32 %v871_v38  ;;  %v905_v24 = vmul.f32 1.442695, %v1865_v35 }
 0x50f   :  { %v1869_v19 = vpop.eup %1868  ;;  %1880 = vtanh.f32 %v737_v18  ;;  %v918_v16 = vmul.f32 %v2566_v17, %v2370_v23 }
 0x510   :  { %v1871_v7 = vpop.eup %1870  ;;  %1882 = vpow2.f32 %v869_v8 }
 0x511   :  { %v1873_v0 = vpop.eup %1872  ;;  %1884 = vtanh.f32 %v734_v59 }
 0x512   :  { %v1875_v27 = vpop.eup %1874  ;;  %1886 = vtanh.f32 %v731_v40  ;;  %v728_v10 = vpop.xlane.xlu0 %727  ;;  %v923_v30 = vmul.f32 %v1873_v0, %v2402_v54 }
 0x513   :  { %v803_v47 = vpop.xlane.xlu1 %802  ;;  %v1877_v33 = vpop.eup %1876  ;;  %1888 = vtanh.f32 %v722_v44  ;;  %999 = vmatpush.msrb.mxu3 %v1875_v27  ;;  %v924_v60 = vmul.f32 %v1875_v27, %v2404_v55 }
 0x514   :  { %v1879_v39 = vpop.eup %1878  ;;  %1890 = vpow2.f32 %v905_v24  ;;  %v907_v41 = vmul.f32 1.442695, %v1877_v33 }
 0x515   :  { %v1881_v61 = vpop.eup %1880  ;;  %1892 = vtanh.f32 %v728_v10  ;;  %941 = vmatpush.msrb.mxu1 %v924_v60  ;;  %1000 = vmatpush.msrb.mxu3 %v1873_v0  ;;  %v922_v44 = vmul.f32 %v1879_v39, %v2393_v49 }
 0x516   :  { %v1883_v59 = vpop.eup %1882  ;;  %1894 = vpow2.f32 %v907_v41  ;;  %v857_v45 = vmul.f32 1.442695, %v1881_v61 }
 0x517   :  { %v1885_v40 = vpop.eup %1884  ;;  %1896 = vtanh.f32 %v725_v15  ;;  %942 = vmatpush.msrb.mxu1 %v923_v30  ;;  %1001 = vmatpush.msrb.mxu3 %v1879_v39  ;;  %v921_v46 = vmul.f32 %v1883_v59, %v2391_v48  ;;  %v920_v15 = vmul.f32 %v1871_v7, %v2385_v43  ;;  %v919_v48 = vmul.f32 %v1869_v19, %v2383_v42 }
 0x518   :  { %v1887_v55 = vpop.eup %1886  ;;  %1898 = vpow2.f32 %v861_v1  ;;  %v855_v54 = vmul.f32 1.442695, %v1885_v40 }
 0x519   :  { %v1889_v50 = vpop.eup %1888  ;;  %943 = vmatpush.msrb.mxu1 %v922_v44  ;;  %1002 = vmatpush.msrb.mxu3 %v1883_v59  ;;  %1900 = vpow2.f32 %v859_v2  ;;  %v853_v11 = vmul.f32 1.442695, %v1887_v55 }
 0x51a   :  { %v2572_v58 = vpop.eup %1890  ;;  %v719_v53 = vpop.xlane.xlu0 %718  ;;  %1902 = vpow2.f32 %v857_v45  ;;  %v847_v3 = vmul.f32 1.442695, %v1889_v50  ;;  %v478_v50 = vld [vmem:[%s2796_s3] sm:$0xff] }
 0x51b   :  { %v1893_v56 = vpop.eup %1892  ;;  %944 = vmatpush.msrb.mxu1 %v921_v46  ;;  %1003 = vmatpush.msrb.mxu3 %v1871_v7  ;;  %v794_v12 = vpop.xlane.xlu1 %793  ;;  %1904 = vtanh.f32 %v719_v53  ;;  %v939_v43 = vmul.f32 %v2572_v58, %v2375_v36 }
 0x51c   :  { %v2575_v49 = vpop.eup %1894  ;;  %1906 = vpow2.f32 %v855_v54  ;;  %v851_v18 = vmul.f32 1.442695, %v1893_v56 }
 0x51d   :  { %v1897_v5 = vpop.eup %1896  ;;  %945 = vmatpush.msrb.mxu1 %v920_v15  ;;  %1004 = vmatpush.msrb.mxu3 %v1869_v19  ;;  %v940_v38 = vmul.f32 %v2575_v49, %v2377_v37  ;;  %1908 = vtanh.f32 %v803_v47 }
 0x51e   :  { %v1899_v57 = vpop.eup %1898  ;;  %1910 = vpow2.f32 %v853_v11  ;;  %v849_v9 = vmul.f32 1.442695, %v1897_v5 }
 0x51f   :  { %946 = vmatpush.msrb.mxu1 %v919_v48  ;;  %1005 = vmatpush.msrb.mxu3 %v2566_v17  ;;  %v1901_v6 = vpop.eup %1900  ;;  %1912 = vpow2.f32 %v847_v3  ;;  %v917_v37 = vmul.f32 %v1899_v57, %v2368_v34  ;;  %v791_v17 = vpop.xlane.xlu2 %790 }
 0x520   :  { %970 = vmatpush.msra.mxu2 %v940_v38  ;;  %v1903_v42 = vpop.eup %1902  ;;  %1914 = vpow2.f32 %v851_v18  ;;  %v916_v35 = vmul.f32 %v1901_v6, %v2356_v29 }
 0x521   :  { %947 = vmatpush.msrb.mxu1 %v918_v16  ;;  %1006 = vmatpush.msrb.mxu3 %v1899_v57  ;;  %v1905_v36 = vpop.eup %1904  ;;  %1916 = vtanh.f32 %v800_v51  ;;  %v915_v34 = vmul.f32 %v1903_v42, %v2354_v28 }
 0x522   :  { %v806_v8 = vpop.xlane.xlu0 %805  ;;  %971 = vmatpush.msra.mxu2 %v939_v43  ;;  %v1907_v23 = vpop.eup %1906  ;;  %1918 = vpow2.f32 %v849_v9  ;;  %v845_v19 = vmul.f32 1.442695, %v1905_v36 }
 0x523   :  { %948 = vmatpush.msrb.mxu1 %v917_v37  ;;  %1007 = vmatpush.msrb.mxu3 %v1901_v6  ;;  %v1909_v7 = vpop.eup %1908  ;;  %1920 = vtanh.f32 %v806_v8  ;;  %v785_v0 = vpop.xlane.xlu1 %784  ;;  %v914_v10 = vmul.f32 %v1907_v23, %v2342_v21 }
 0x524   :  { %v1911_v24 = vpop.eup %1910  ;;  %1922 = vtanh.f32 %v794_v12  ;;  %v901_v29 = vmul.f32 1.442695, %v1909_v7 }
 0x525   :  { %949 = vmatpush.msrb.mxu1 %v916_v35  ;;  %1008 = vmatpush.msrb.mxu3 %v1903_v42  ;;  %v1913_v27 = vpop.eup %1912  ;;  %1924 = vpow2.f32 %v845_v19  ;;  %v913_v60 = vmul.f32 %v1911_v24, %v2340_v20  ;;  %v1982_v42 = vld [vmem:[#allocation3 + $0xc8] sm:$0xff]  ;;  %v1983_v35 = vld [vmem:[#allocation3 + $0xc0] sm:$0xff] }
 0x526   :  { %v1915_v47 = vpop.eup %1914  ;;  %1926 = vtanh.f32 %v791_v17  ;;  %v910_v44 = vmul.f32 %v1913_v27, %v2326_v14  ;;  %v482_v17 = vld [vmem:[%s2796_s3 + $0x20] sm:$0xff] }
 0x527   :  { %950 = vmatpush.msrb.mxu1 %v915_v34  ;;  %1009 = vmatpush.msrb.mxu3 %v1907_v23  ;;  %v1917_v33 = vpop.eup %1916  ;;  %v912_v28 = vmul.f32 %v1915_v47, %v2334_v22  ;;  %1928 = vpow2.f32 %v901_v29  ;;  %v782_v59 = vpop.xlane.xlu2 %781 }
 0x528   :  { %v1919_v39 = vpop.eup %1918  ;;  %v899_v30 = vmul.f32 1.442695, %v1917_v33  ;;  %v1985_v33 = vld [vmem:[#allocation3 + $0xb0] sm:$0xff] }
 0x529   :  { %951 = vmatpush.msrb.mxu1 %v914_v10  ;;  %1010 = vmatpush.msrb.mxu3 %v1911_v24  ;;  %v1921_v41 = vpop.eup %1920  ;;  %v911_v2 = vmul.f32 %v1919_v39, %v2332_v4 }
 0x52a   :  { %v797_v1 = vpop.xlane.xlu0 %796  ;;  %v1923_v61 = vpop.eup %1922  ;;  %v903_v21 = vmul.f32 1.442695, %v1921_v41 }
 0x52b   :  { %952 = vmatpush.msrb.mxu1 %v913_v60  ;;  %1011 = vmatpush.msrb.mxu3 %v1915_v47  ;;  %1930 = vtanh.f32 %v797_v1  ;;  %v1925_v40 = vpop.eup %1924  ;;  %v895_v20 = vmul.f32 1.442695, %v1923_v61  ;;  %v776_v22 = vpop.xlane.xlu1 %775 }
 0x52c   :  { %1932 = vpow2.f32 %v903_v21  ;;  %v1927_v55 = vpop.eup %1926  ;;  %v909_v45 = vmul.f32 %v1925_v40, %v2324_v13  ;;  %v1986_v21 = vld [vmem:[#allocation3 + $0xa0] sm:$0xff] }
 0x52d   :  { %953 = vmatpush.msrb.mxu1 %v912_v28  ;;  %1012 = vmatpush.msrb.mxu3 %v1919_v39  ;;  %1934 = vtanh.f32 %v785_v0  ;;  %v1929_v4 = vpop.eup %1928  ;;  %v893_v14 = vmul.f32 1.442695, %v1927_v55  ;;  %v484_v28 = vld [vmem:[%s2796_s3 + $0x30] sm:$0xff] }
 0x52e   :  { %1936 = vpow2.f32 %v899_v30  ;;  %v937_v12 = vmul.f32 %v1929_v4, %v2361_v31 }
 0x52f   :  { %954 = vmatpush.msrb.mxu1 %v911_v2  ;;  %1013 = vmatpush.msrb.mxu3 %v1913_v27  ;;  %1938 = vtanh.f32 %v782_v59  ;;  %v773_v11 = vpop.xlane.xlu2 %772  ;;  %v1984_v27 = vld [vmem:[#allocation3 + $0xb8] sm:$0xff] }
 0x530   :  { %1940 = vpow2.f32 %v895_v20 }
 0x531   :  { %955 = vmatpush.msrb.mxu1 %v910_v44  ;;  %1014 = vmatpush.msrb.mxu3 %v1925_v40  ;;  %v1931_v54 = vpop.eup %1930  ;;  %1942 = vtanh.f32 %v776_v22  ;;  %v1987_v40 = vld [vmem:[#allocation3 + $0x98] sm:$0xff] }
 0x532   :  { %v788_v46 = vpop.xlane.xlu0 %787  ;;  %1015 = vmatmul.f32.vlgmr.msrb.gmra.mxu3 %v478_v50  ;;  %v1933_v51 = vpop.eup %1932  ;;  %v897_v53 = vmul.f32 1.442695, %v1931_v54 }
 0x533   :  { %956 = vmatpush.msrb.mxu1 %v909_v45  ;;  %v1935_v56 = vpop.eup %1934  ;;  %1944 = vtanh.f32 %v788_v46  ;;  %v938_v13 = vmul.f32 %v1933_v51, %v2363_v32  ;;  %v480_v32 = vld [vmem:[%s2796_s3 + $0x10] sm:$0xff]  ;;  %v767_v57 = vpop.xlane.xlu1 %766  ;;  %v1989_v45 = vld [vmem:[#allocation3 + $0x88] sm:$0xff]  ;;  %v1990_v46 = vld [vmem:[#allocation3 + $0x80] sm:$0xff] }
 0x534   :  { %957 = vmatmul.f32.vlgmr.msrb.gmra.mxu1 %v478_v50  ;;  %v1937_v15 = vpop.eup %1936  ;;  %1946 = vpow2.f32 %v897_v53  ;;  %v889_v3 = vmul.f32 1.442695, %v1935_v56  ;;  %v485_v53 = vld [vmem:[%s2796_s3 + $0x38] sm:$0xff] }
 0x535   :  { %1028 = vmatpush.msra.mxu1 %v2575_v49  ;;  %972 = vmatpush.msra.mxu2 %v938_v13  ;;  %v1939_v5 = vpop.eup %1938  ;;  %1948 = vpow2.f32 %v893_v14  ;;  %v936_v49 = vmul.f32 %v1937_v15, %v2349_v26  ;;  %v483_v14 = vld [vmem:[%s2796_s3 + $0x28] sm:$0xff]  ;;  %v2062_v13 = vmov 0  }
 0x536   :  { %v1941_v48 = vpop.eup %1940  ;;  %1950 = vtanh.f32 %v773_v11  ;;  %v887_v43 = vmul.f32 1.442695, %v1939_v5  ;;  %1776 = vset.pattern.permute.xlu2 %v2062_v13  ;;  %1777 = vset.pattern.permute.xlu0 %v2062_v13 }
 0x537   :  { %1029 = vmatpush.msra.mxu1 %v2572_v58  ;;  %973 = vmatpush.msra.mxu2 %v937_v12  ;;  %v1943_v38 = vpop.eup %1942  ;;  %v934_v8 = vmul.f32 %v1982_v42, %v1941_v48 }
 0x538   :  { %v883_v9 = vmul.f32 1.442695, %v1943_v38  ;;  %1778 = vset.pattern.permute.xlu1 %v2062_v13 }
 0x539   :  { %1030 = vmatpush.msra.mxu1 %v1933_v51  ;;  %v1945_v18 = vpop.eup %1944  ;;  %974 = vmatpush.msra.mxu2 %v936_v49  ;;  %v481_v51 = vld [vmem:[%s2796_s3 + $0x18] sm:$0xff] }
 0x53a   :  { %v779_v58 = vpop.xlane.xlu0 %778  ;;  %1018 = vmatmul.f32.gmra.mxu3 %v480_v32  ;;  %v1947_v31 = vpop.eup %1946  ;;  %v891_v16 = vmul.f32 1.442695, %v1945_v18 }
 0x53b   :  { %1031 = vmatpush.msra.mxu1 %v1929_v4  ;;  %1952 = vtanh.f32 %v779_v58  ;;  %v935_v26 = vmul.f32 %v1947_v31, %v2347_v25  ;;  %v1949_v6 = vpop.eup %1948  ;;  %v479_v4 = vld [vmem:[%s2796_s3 + $0x8] sm:$0xff] }
 0x53c   :  { %1954 = vpow2.f32 %v889_v3  ;;  %960 = vmatmul.f32.gmra.mxu1 %v480_v32  ;;  %v1951_v37 = vpop.eup %1950  ;;  %v933_v23 = vmul.f32 %v1983_v35, %v1949_v6 }
 0x53d   :  { %1032 = vmatpush.msra.mxu1 %v1937_v15  ;;  %1956 = vtanh.f32 %v767_v57  ;;  %975 = vmatpush.msra.mxu2 %v935_v26  ;;  %v881_v19 = vmul.f32 1.442695, %v1951_v37 }
 0x53e   :  { %1958 = vpow2.f32 %v891_v16 }
 0x53f   :  { %1033 = vmatpush.msra.mxu1 %v1947_v31  ;;  %1960 = vpow2.f32 %v887_v43  ;;  %976 = vmatpush.msra.mxu2 %v934_v8 }
 0x540   :  { %1962 = vpow2.f32 %v883_v9  ;;  %v1712_v9 = vld [vmem:[%s2795_s1 + $0x30] sm:$0xff] }
 0x541   :  { %1034 = vmatpush.msra.mxu1 %v1941_v48  ;;  %v1953_v36 = vpop.eup %1952  ;;  %977 = vmatpush.msra.mxu2 %v933_v23 }
 0x542   :  { %v1955_v25 = vpop.eup %1954  ;;  %v885_v7 = vmul.f32 1.442695, %v1953_v36  ;;  %v770_v34 = vpop.xlane.xlu0 %769  ;;  %1021 = vmatmul.f32.gmra.mxu3 %v482_v17 }
 0x543   :  { %1035 = vmatpush.msra.mxu1 %v1949_v6  ;;  %v1957_v24 = vpop.eup %1956  ;;  %1964 = vtanh.f32 %v770_v34  ;;  %v931_v60 = vmul.f32 %v1985_v33, %v1955_v25  ;;  %v1713_v6 = vld [vmem:[%s2795_s1 + $0x38] sm:$0xff] }
 0x544   :  { %v1959_v0 = vpop.eup %1958  ;;  %1966 = vpow2.f32 %v885_v7  ;;  %963 = vmatmul.f32.gmra.mxu1 %v482_v17  ;;  %v877_v29 = vmul.f32 1.442695, %v1957_v24 }
 0x545   :  { %1036 = vmatpush.msra.mxu1 %v1959_v0  ;;  %v932_v10 = vmul.f32 %v1984_v27, %v1959_v0  ;;  %v1961_v47 = vpop.eup %1960  ;;  %1968 = vpow2.f32 %v881_v19 }
 0x546   :  { %v1963_v39 = vpop.eup %1962  ;;  %v930_v41 = vmul.f32 %v1961_v47, %v2398_v52  ;;  %1970 = vpow2.f32 %v877_v29  ;;  %v1988_v52 = vld [vmem:[#allocation3 + $0x90] sm:$0xff] }
 0x547   :  { %978 = vmatpush.msra.mxu2 %v932_v10  ;;  %1037 = vmatpush.msra.mxu1 %v1955_v25  ;;  %v928_v20 = vmul.f32 %v1987_v40, %v1963_v39 }
 0x549   :  { %v1965_v1 = vpop.eup %1964  ;;  %979 = vmatpush.msra.mxu2 %v931_v60  ;;  %1038 = vmatpush.msra.mxu1 %v1961_v47 }
 0x54a   :  { %v1967_v61 = vpop.eup %1966  ;;  %v879_v30 = vmul.f32 1.442695, %v1965_v1  ;;  %1024 = vmatmul.f32.gmra.mxu3 %v484_v28 }
 0x54b   :  { %980 = vmatpush.msra.mxu2 %v930_v41  ;;  %1039 = vmatpush.msra.mxu1 %v1967_v61  ;;  %v929_v59 = vmul.f32 %v1986_v21, %v1967_v61  ;;  %v1969_v2 = vpop.eup %1968 }
 0x54c   :  { %1972 = vpow2.f32 %v879_v30  ;;  %966 = vmatmul.f32.gmra.mxu1 %v484_v28  ;;  %v927_v44 = vmul.f32 %v1988_v52, %v1969_v2  ;;  %v1971_v22 = vpop.eup %1970 }
 0x54d   :  { %981 = vmatpush.msra.mxu2 %v929_v59  ;;  %1040 = vmatpush.msra.mxu1 %v1963_v39  ;;  %v925_v54 = vmul.f32 %v1990_v46, %v1971_v22 }
 0x54f   :  { %982 = vmatpush.msra.mxu2 %v928_v20  ;;  %1041 = vmatpush.msra.mxu1 %v1969_v2 }
 0x551   :  { %983 = vmatpush.msra.mxu2 %v927_v44 }
 0x552   :  { %v1973_v55 = vpop.eup %1972 }
 0x553   :  { %1042 = vmatpush.msra.mxu1 %v1973_v55  ;;  %v926_v50 = vmul.f32 %v1989_v45, %v1973_v55 }
 0x555   :  { %984 = vmatpush.msra.mxu2 %v926_v50  ;;  %1043 = vmatpush.msra.mxu1 %v1971_v22 }
 0x556   :  { %1044 = vmatmul.f32.vlgmr.msra.gmra.mxu1 %v479_v4 }
 0x557   :  { %985 = vmatpush.msra.mxu2 %v925_v54 }
 0x558   :  { %986 = vmatmul.f32.vlgmr.msra.gmra.mxu2 %v479_v4 }
 0x559   :  { %1169 = vmatpush.bf16.msrb.mxu2 %v1713_v6 }
 0x55d   :  { %1170 = vmatpush.bf16.msrb.mxu2 %v1712_v9  ;;  %v2664_v9 = vld [vmem:[%s2795_s1 + $0x40] sm:$0xf] }
 0x55e   :  { %1047 = vmatmul.f32.gmra.mxu1 %v481_v51 }
 0x560   :  { %989 = vmatmul.f32.gmra.mxu2 %v481_v51 }
 0x566   :  { %1050 = vmatmul.f32.gmra.mxu1 %v483_v14 }
 0x568   :  { %992 = vmatmul.f32.gmra.mxu2 %v483_v14 }
 0x56e   :  { %1053 = vmatmul.f32.gmra.mxu1 %v485_v53 }
 0x570   :  { %995 = vmatmul.f32.gmra.mxu2 %v485_v53 }
 0x5b1   :  { %v2625_v56 = vpop.f32.mrf.mxu1 }
 0x5b5   :  { %v1016_v5 = vpop.f32.mrf.mxu3 }
 0x5b9   :  { %v2630_v15 = vpop.f32.mrf.mxu1 }
 0x5bd   :  { %v1019_v49 = vpop.f32.mrf.mxu3 }
 0x5c1   :  { %v2632_v11 = vpop.f32.mrf.mxu1 }
 0x5c5   :  { %v1022_v57 = vpop.f32.mrf.mxu3 }
 0x5c9   :  { %v2634_v12 = vpop.f32.mrf.mxu1 }
 0x5cd   :  { %v1025_v31 = vpop.f32.mrf.mxu3 }
 0x5d3   :  { %v1045_v3 = vpop.f32.mrf.mxu1 }
 0x5d4   :  { %v1046_v48 = vadd.f32 %v1045_v3, %v1016_v5 }
 0x5d6   :  { %1059 = vperm.xlu2 %1776, %v1046_v48  }
 0x5db   :  { %v1048_v32 = vpop.f32.mrf.mxu1  ;;  %v987_v37 = vpop.f32.mrf.mxu2 }
 0x5dc   :  { %v1049_v38 = vadd.f32 %v1048_v32, %v1019_v49  ;;  %v988_v21 = vadd.f32 %v987_v37, %v2625_v56  ;;  %v2669_v37 = vld [vmem:[%s2795_s1 + $0x40] sm:$0xf0] }
 0x5de   :  { %1064 = vperm.xlu0 %1777, %v1049_v38  }
 0x5e3   :  { %v1051_v58 = vpop.f32.mrf.mxu1  ;;  %v990_v25 = vpop.f32.mrf.mxu2 }
 0x5e4   :  { %v1052_v18 = vadd.f32 %v1051_v58, %v1022_v57  ;;  %v991_v44 = vadd.f32 %v990_v25, %v2630_v15 }
 0x5e6   :  { %1069 = vperm.xlu1 %1778, %v1052_v18  }
 0x5eb   :  { %v1054_v43 = vpop.f32.mrf.mxu1  ;;  %v993_v60 = vpop.f32.mrf.mxu2 }
 0x5ec   :  { %v1055_v16 = vadd.f32 %v1054_v43, %v1025_v31  ;;  %v994_v58 = vadd.f32 %v993_v60, %v2632_v11  ;;  %v2674_v11 = vld [vmem:[%s2795_s1 + $0x48] sm:$0xf] }
 0x5ee   :  { %1074 = vperm.xlu2 %1776, %v1055_v16  }
 0x5f3   :  { %v996_v48 = vpop.f32.mrf.mxu2 }
 0x5f4   :  { %v997_v18 = vadd.f32 %v996_v48, %v2634_v12  ;;  %v2679_v12 = vld [vmem:[%s2795_s1 + $0x48] sm:$0xf0] }
 0x630   :  { %v1060_v26 = vpop.permute.xlu2 %1059 }
 0x631   :  { %1974 = vrcp.f32 %v1060_v26  ;;  %v1088_v27 = vand.u32 2147483648, %v1060_v26  ;;  %vm1082_vm4 = vweird.f32 %v1060_v26  ;;  %v1086_v29 = vand.u32 2147483647, %v1060_v26 }
 0x633   :  { %v1089_v28 = vor.u32 1.1754944e-38, %v1088_v27  ;;  %vm1087_vm8 = vcmp.eq.f32.partialorder %v1086_v29, 8.507059e+37 }
 0x637   :  { %v1975_v42 = vpop.eup %1974 }
 0x638   :  { %v1078_v36 = vmul.f32 %v1975_v42, %v1060_v26  ;;  %vm1083_vm3 = vweird.f32 %v1975_v42 }
 0x639   :  { %vm1084_vm5 = vmor %vm1082_vm4, %vm1083_vm3 }
 0x63a   :  { %v1079_v35 = vsub.f32 1.0, %v1078_v36 }
 0x63c   :  { %v1080_v19 = vmul.f32 %v1975_v42, %v1079_v35 }
 0x63e   :  { %v1081_v24 = vadd.f32 %v1975_v42, %v1080_v19 }
 0x640   :  { %v1085_v41 = vsel %vm1084_vm5, %v1975_v42, %v1081_v24  ;;  %v2684_v42 = vld [vmem:[%s2799_s2 + $0x28] sm:$0x1]  ;;  %v2693_v24 = vmov 0.0  }
 0x641   :  { %v1090_v2 = vsel %vm1087_vm8, %v1089_v28, %v1085_v41 }
 0x642   :  { %v1091_v51 = vmul.f32 %v1090_v2, %v988_v21 }
 0x648   :  { %v1075_v8 = vpop.permute.xlu2 %1074 }
 0x649   :  { %1976 = vrcp.f32 %v1075_v8  ;;  %vm1127_vm12 = vweird.f32 %v1075_v8  ;;  %v1133_v45 = vand.u32 2147483648, %v1075_v8  ;;  %v1131_v46 = vand.u32 2147483647, %v1075_v8 }
 0x64b   :  { %v1134_v49 = vor.u32 1.1754944e-38, %v1133_v45  ;;  %vm1132_vm8 = vcmp.eq.f32.partialorder %v1131_v46, 8.507059e+37 }
 0x64f   :  { %v2642_v23 = vpop.eup %1976 }
 0x650   :  { %v1065_v17 = vpop.permute.xlu0 %1064  ;;  %v1123_v7 = vmul.f32 %v2642_v23, %v1075_v8  ;;  %vm1128_vm13 = vweird.f32 %v2642_v23  ;;  %v1781_v8 = vld [vmem:[%s2799_s2 + $0x20] ss:$0 sm:$0xff] }
 0x651   :  { %1978 = vrcp.f32 %v1065_v17  ;;  %v1103_v1 = vand.u32 2147483648, %v1065_v17  ;;  %v1101_v30 = vand.u32 2147483647, %v1065_v17  ;;  %vm1097_vm11 = vweird.f32 %v1065_v17  ;;  %vm2650_vm4 = vmor %vm1127_vm12, %vm1128_vm13 }
 0x652   :  { %v1124_v0 = vsub.f32 1.0, %v1123_v7 }
 0x653   :  { %v1104_v52 = vor.u32 1.1754944e-38, %v1103_v1  ;;  %vm1102_vm3 = vcmp.eq.f32.partialorder %v1101_v30, 8.507059e+37 }
 0x654   :  { %v1125_v39 = vmul.f32 %v2642_v23, %v1124_v0 }
 0x656   :  { %v1126_v20 = vadd.f32 %v2642_v23, %v1125_v39 }
 0x657   :  { %v1979_v34 = vpop.eup %1978 }
 0x658   :  { %v1093_v10 = vmul.f32 %v1979_v34, %v1065_v17  ;;  %v1070_v47 = vpop.permute.xlu1 %1069  ;;  %vm1098_vm6 = vweird.f32 %v1979_v34  ;;  %v1130_v56 = vsel %vm2650_vm4, %v2642_v23, %v1126_v20 }
 0x659   :  { %1980 = vrcp.f32 %v1070_v47  ;;  %vm1099_vm14 = vmor %vm1097_vm11, %vm1098_vm6  ;;  %vm1112_vm5 = vweird.f32 %v1070_v47  ;;  %v1118_v53 = vand.u32 2147483648, %v1070_v47  ;;  %v1116_v5 = vand.u32 2147483647, %v1070_v47 }
 0x65a   :  { %v1094_v33 = vsub.f32 1.0, %v1093_v10  ;;  %v1135_v57 = vsel %vm1132_vm8, %v1134_v49, %v1130_v56 }
 0x65b   :  { %v1119_v38 = vor.u32 1.1754944e-38, %v1118_v53  ;;  %vm1117_vm12 = vcmp.eq.f32.partialorder %v1116_v5, 8.507059e+37  ;;  %v1136_v26 = vmul.f32 %v1135_v57, %v997_v18 }
 0x65c   :  { %v1095_v61 = vmul.f32 %v1979_v34, %v1094_v33 }
 0x65e   :  { %v1096_v59 = vadd.f32 %v1979_v34, %v1095_v61 }
 0x65f   :  { %v1981_v40 = vpop.eup %1980 }
 0x660   :  { %v1100_v22 = vsel %vm1099_vm14, %v1979_v34, %v1096_v59  ;;  %v1108_v55 = vmul.f32 %v1981_v40, %v1070_v47  ;;  %vm1113_vm6 = vweird.f32 %v1981_v40 }
 0x661   :  { %v1105_v50 = vsel %vm1102_vm3, %v1104_v52, %v1100_v22  ;;  %vm1114_vm11 = vmor %vm1112_vm5, %vm1113_vm6 }
 0x662   :  { %v1109_v54 = vsub.f32 1.0, %v1108_v55  ;;  %v1106_v14 = vmul.f32 %v1105_v50, %v991_v44 }
 0x664   :  { %v1110_v15 = vmul.f32 %v1981_v40, %v1109_v54  ;;  %v1137_v3 = vpack.c.bf16 %v1106_v14, %v1091_v51 }
 0x666   :  { %v1111_v32 = vadd.f32 %v1981_v40, %v1110_v15  ;;  %1653 = vmatmul.msk.bf16.vlgmr.msrb.gmra.mxu2 %vm148_vm0, %v1137_v3 }
 0x668   :  { %v1115_v31 = vsel %vm1114_vm11, %v1981_v40, %v1111_v32 }
 0x669   :  { %v1120_v43 = vsel %vm1117_vm12, %v1119_v38, %v1115_v31 }
 0x66a   :  { %v1121_v16 = vmul.f32 %v1120_v43, %v994_v58 }
 0x66c   :  { %v1138_v6 = vpack.c.bf16 %v1136_v26, %v1121_v16 }
 0x676   :  { %1654 = vmatmul.msk.bf16.gmra.mxu2 %vm148_vm0, %v1138_v6 }
 0x6e9   :  { %v1172_v36 = vpop.f32.mrf.mxu2 }
 0x6ea   :  { %v1173_v35 = vadd.f32 %v1781_v8, %v1172_v36 }
 0x6ec   :  { %1182 = vst.msk [vmem:[#allocation4] sm:$0xff] %vm286_vm1, %v1173_v35 }
 0x6f1   :  { %v1174_v23 = vpop.f32.mrf.mxu2 }
 0x6f2   :  { %v1175_v17 = vadd.f32 %v1781_v8, %v1174_v23 }
 0x6f4   :  { %1183 = vst.msk [vmem:[#allocation4 + $0x8] sm:$0xff] %vm286_vm1, %v1175_v17 }
 0x6f9   :  { %v1177_v25 = vpop.f32.mrf.mxu2 }
 0x6fa   :  { %v1178_v19 = vadd.f32 %v1781_v8, %v1177_v25 }
 0x6fc   :  { %1184 = vst.msk [vmem:[#allocation4 + $0x10] sm:$0xff] %vm286_vm1, %v1178_v19 }
 0x701   :  { %v1179_v7 = vpop.f32.mrf.mxu2 }
 0x702   :  { %v1180_v34 = vadd.f32 %v1781_v8, %v1179_v7 }
 0x704   :  { %1185 = vst.msk [vmem:[#allocation4 + $0x18] sm:$0xff] %vm286_vm1, %v1180_v34 }
 0x705 LB: > { %v1666_v0 = vor.u32 %v2679_v12, %v2674_v11  ;;  %v1214_v27 = vpack.c.bf16 %v2054_v24, %v2054_v24  ;;  %v1662_v10 = vor.u32 %v2669_v37, %v2664_v9  ;;  %s2063_s12 = smov 96   ;;  %v1215_v29 = vperm.slane %v2684_v42, 0  ;;  %s2064_s13 = smov 64   ;;  %s2058_s11 = sphi %s2695_s11, %s1196_s11   ;;  %v2054_v24 = vphi %v2693_v24, %v1285_v24  }
 0x706   : > { %s1199_s14 = ssub.s32 0, %s2058_s11  ;;  %p1198_p2 = scmp.lt.s32.totalorder %s2058_s11, 0 }
 0x707   : > { %1240 = vmatpush.bf16.msra.mxu0 %v1666_v0  ;;  %1217 = vrot.lane.b32.xlu0 %v1214_v27, %s2063_s12  ;;  %s1655_s15 = smin.u32 %s2058_s11, %s1199_s14  ;;  %s1204_s18 = sadd.s32 3, %s2058_s11 }
 0x708   : > { %s1201_s16 = sand.u32 3, %s1655_s15   ;;  %s1657_s21 = sshll.u32 %s2058_s11, 3 }
 0x709   : > { %s1202_s17 = ssub.s32 0, %s1201_s16  ;;  %s1209_s3 = scalar_lea.vmem [#allocation4], %s1657_s21 }
 0x70a   : > { %s2809_s17 = smov (!%p1198_p2, %s1202_s17), %s1201_s16  ;;  %s1290_s24 = scalar_lea.vmem [#allocation5], %s1657_s21 }
 0x70b   : > { %1241 = vmatpush.bf16.msra.mxu0 %v1662_v10  ;;  %s1656_s19 = sshll.u32 %s2809_s17, 1  ;;  %v1210_v1 = vld [vmem:[%s1209_s3] sm:$0xff]  ;;  %s1196_s11 = sadd.s32 1, %s2058_s11  }
 0x70c   : > { %s2717_s20 = ssub.s32 %s1204_s18, %s1656_s19  ;;  %p1193_p3 = scmp.ge.s32.totalorder %s1196_s11, 4  }
 0x70d   : > { %s1658_s22 = sshll.u32 %s2717_s20, 3  ;;  %v1717_v49 = vld [vmem:[%s2795_s1 + $0x58] sm:$0xff] (%p1193_p3)  ;;  %v1716_v32 = vld [vmem:[%s2795_s1 + $0x50] sm:$0xff] (%p1193_p3)  ;;  %1997 = vset.pattern.permute.xlu2 (%p1193_p3), %v2062_v13  ;;  %1998 = vset.pattern.permute.xlu0 (%p1193_p3), %v2062_v13 }
 0x70e   : > { %s1211_s23 = scalar_lea.vmem [#allocation4], %s1658_s22  ;;  %s1293_s25 = scalar_lea.vmem [#allocation5], %s1658_s22  ;;  %1730 = vmatpush.bf16.msra.mxu1 (%p1193_p3), %v1717_v49  ;;  %v1999_v43 = vld [vmem:[%s2799_s2 + $0x30] ss:$0 sm:$0xff] (%p1193_p3)  ;;  %v2000_v12 = vld [vmem:[%s2799_s2 + $0x38] ss:$0 sm:$0xff] (%p1193_p3) }
 0x70f   : > { %v1212_v41 = vld [vmem:[%s1211_s23] sm:$0xff] }
 0x710   : > { %v1213_v28 = vsel %vm334_vm10, %v1210_v1, %v1212_v41 }
 0x712   :  { %1731 = vmatpush.bf16.msra.mxu1 (%p1193_p3), %v1716_v32 }
 0x779   : > { %v1218_v47 = vpop.permute.xlu0 %1217 }
 0x77a   : > { %1667 = vmatmul.msk.bf16.vlgmr.msra.gmra.mxu0 %vm148_vm0, %v1218_v47 }
 0x77b   :  { %1334 = vmatpush.bf16.msra.mxu0 (%p1193_p3), %v1717_v49 }
 0x77f   :  { %1335 = vmatpush.bf16.msra.mxu0 (%p1193_p3), %v1716_v32 }
 0x7f7   : > { %v1243_v33 = vpop.f32.mrf.mxu0 }
 0x7f8   : > { %v1244_v60 = vadd.f32 %v1243_v33, %v1215_v29 }
 0x7fa   : > { %1268 = vrot.lane.b32.xlu0 %v1244_v60, %s2064_s13  ;;  %v1247_v61 = vadd.f32 %v1244_v60, %v1213_v28 }
 0x7fc   : > { %v1668_v30 = vmul.f32 -1.442695, %v1247_v61 }
 0x7fe   : > { %1991 = vpow2.f32 %v1668_v30 }
 0x7ff   : > { %v1245_v39 = vpop.f32.mrf.mxu0 }
 0x804   : > { %v1992_v21 = vpop.eup %1991 }
 0x805   : > { %v1251_v59 = vadd.f32 1.0, %v1992_v21 }
 0x807   : > { %1993 = vrcp.f32 %v1251_v59  ;;  %v1263_v22 = vand.u32 2147483648, %v1251_v59  ;;  %vm1257_vm13 = vweird.f32 %v1251_v59  ;;  %v1261_v55 = vand.u32 2147483647, %v1251_v59 }
 0x809   : > { %v1264_v50 = vor.u32 1.1754944e-38, %v1263_v22  ;;  %vm1262_vm3 = vcmp.eq.f32.partialorder %v1261_v55, 8.507059e+37  ;;  %v1306_v55 = vld [vmem:[%s2799_s2 + $0x48] sm:$0xff] (%p1193_p3) }
 0x80d   : > { %v1994_v2 = vpop.eup %1993 }
 0x80e   : > { %v1253_v40 = vmul.f32 %v1994_v2, %v1251_v59  ;;  %vm1258_vm1 = vweird.f32 %v1994_v2 }
 0x80f   : > { %vm1259_vm14 = vmor %vm1257_vm13, %vm1258_vm1 }
 0x810   : > { %v1254_v20 = vsub.f32 1.0, %v1253_v40 }
 0x812   : > { %v1255_v52 = vmul.f32 %v1994_v2, %v1254_v20 }
 0x814   : > { %v1256_v44 = vadd.f32 %v1994_v2, %v1255_v52 }
 0x816   : > { %v1260_v45 = vsel %vm1259_vm14, %v1994_v2, %v1256_v44 }
 0x817   : > { %v1265_v46 = vsel %vm1262_vm3, %v1264_v50, %v1260_v45 }
 0x818   : > { %v1278_v56 = vsub.f32 1.0, %v1265_v46  ;;  %v1284_v3 = vmul.f32 %v2054_v24, %v1265_v46 }
 0x86c   : > { %v1269_v4 = vpop.permute.xlu0 %1268 }
 0x86d   : > { %v1271_v54 = vmul.f32 %v1269_v4, %v1265_v46  ;;  %v1719_v4 = vld [vmem:[%s2795_s1 + $0x68] sm:$0xff] (%p1193_p3)  ;;  %v1718_v46 = vld [vmem:[%s2795_s1 + $0x60] sm:$0xff] (%p1193_p3) }
 0x86e   :  { %1475 = vmatpush.bf16.msra.mxu3 (%p1193_p3), %v1719_v4 }
 0x86f   : > { %1273 = vrot.lane.b32.xlu1 %v1271_v54, %s2064_s13 }
 0x872   :  { %1476 = vmatpush.bf16.msra.mxu3 (%p1193_p3), %v1718_v46 }
 0x8e1   : > { %v1274_v51 = vpop.permute.xlu1 %1273 }
 0x8e2   : > { %v1276_v14 = vadd.f32 %v1274_v51, %v1213_v28 }
 0x8e4   : > { %1995 = vtanh.f32 %v1276_v14 }
 0x8ea   : > { %v1996_v53 = vpop.eup %1995 }
 0x8eb   : > { %1280 = vrot.lane.b32.xlu1 %v1996_v53, %s2063_s12 }
 0x95d   : > { %v1281_v15 = vpop.permute.xlu1 %1280 }
 0x95e   : > { %v1283_v5 = vmul.f32 %v1281_v15, %v1278_v56 }
 0x960   : > { %v1285_v24 = vadd.f32 %v1284_v3, %v1283_v5  }
 0x962   : > { %1287 = vrot.lane.b32.xlu2 %v1285_v24, %s2063_s12 }
 0x9ba   :  { %1195 = sbr.rel (!%p1193_p3) target bundleno = 1797 (0x705), region = 69 }
 0x9bc   : > { %v1288_v48 = vpop.permute.xlu2 %1287 }
 0x9bd   : > { %1292 = vst.msk [vmem:[%s1290_s24] sm:$0xff] %vm435_vm15, %v1288_v48 }
 0x9be   : > { %1295 = vst.msk [vmem:[%s1293_s25] sm:$0xff] %vm438_vm2, %v1288_v48 }
 0x9c5   :  { %v2753_v38 = vld [vmem:[#allocation5] sm:$0xff]  ;;  %v2755_v57 = vld [vmem:[#allocation5 + $0x8] sm:$0xff]  ;;  %v2757_v58 = vld [vmem:[#allocation5 + $0x10] sm:$0xff] }
 0x9c6   :  { %v1299_v62 = vld [vmem:[#allocation5 + $0x18] sm:$0xff]  ;;  %v1307_v63 = vpack.c.bf16 %v2755_v57, %v2753_v38 }
 0x9c7   :  { %v1308_v18 = vpack.c.bf16 %v1299_v62, %v2757_v58 }
 0x9c8   :  { %1677 = vmatmul.msk.bf16.vlgmr.msra.gmra.mxu0 %vm148_vm0, %v1307_v63 }
 0x9c9   :  { %1678 = vmatmul.msk.bf16.vlgmr.msra.gmra.mxu1 %vm148_vm0, %v1308_v18 }
 0xa45   :  { %v1337_v13 = vpop.f32.mrf.mxu0 }
 0xa46   :  { %v1342_v31 = vpop.f32.mrf.mxu1  ;;  %v1338_v37 = vadd.f32 %v1999_v43, %v1337_v13 }
 0xa47   :  { %v1343_v11 = vadd.f32 %v1999_v43, %v1342_v31 }
 0xa4d   :  { %v1339_v16 = vpop.f32.mrf.mxu0 }
 0xa4e   :  { %v1344_v26 = vpop.f32.mrf.mxu1  ;;  %v1340_v6 = vadd.f32 %v1999_v43, %v1339_v16 }
 0xa4f   :  { %v1345_v9 = vadd.f32 %v1999_v43, %v1344_v26 }
 0xa50   :  { %2002 = vtanh.f32 %v1340_v6 }
 0xa51   :  { %2004 = vtanh.f32 %v1345_v9 }
 0xa52   :  { %2006 = vtanh.f32 %v1338_v37 }
 0xa53   :  { %2008 = vtanh.f32 %v1343_v11 }
 0xa56   :  { %v2003_v42 = vpop.eup %2002 }
 0xa57   :  { %v2005_v8 = vpop.eup %2004  ;;  %v1353_v36 = vmul.f32 %v2003_v42, %v2000_v12 }
 0xa58   :  { %v1355_v35 = vmul.f32 %v2005_v8, %v2000_v12  ;;  %v2007_v17 = vpop.eup %2006 }
 0xa59   :  { %v1359_v23 = vsel %vm148_vm0, %v1353_v36, 0.0  ;;  %v2009_v19 = vpop.eup %2008  ;;  %v1352_v7 = vmul.f32 %v2007_v17, %v2000_v12 }
 0xa5a   :  { %v1365_v25 = vsel %vm148_vm0, %v1355_v35, 0.0  ;;  %1360 = vadd.xlane.f32.xlu1 %v1359_v23  ;;  %v1354_v34 = vmul.f32 %v2009_v19, %v2000_v12 }
 0xa5b   :  { %1366 = vadd.xlane.f32.xlu0 %v1365_v25  ;;  %v1356_v24 = vsel %vm148_vm0, %v1352_v7, 0.0 }
 0xa5c   :  { %v1362_v0 = vsel %vm148_vm0, %v1354_v34, 0.0 }
 0xa62   :  { %1357 = vadd.xlane.f32.xlu1 %v1356_v24 }
 0xa63   :  { %1363 = vadd.xlane.f32.xlu0 %v1362_v0 }
 0xacd   :  { %v1361_v27 = vpop.xlane.xlu1 %1360 }
 0xace   :  { %v1367_v10 = vpop.xlane.xlu0 %1366 }
 0xacf   :  { %2010 = vtanh.f32 %v1367_v10 }
 0xad0   :  { %2012 = vtanh.f32 %v1361_v27 }
 0xad5   :  { %v2011_v47 = vpop.eup %2010  ;;  %v1358_v29 = vpop.xlane.xlu1 %1357 }
 0xad6   :  { %v1378_v33 = vmul.f32 1.442695, %v2011_v47  ;;  %v1364_v60 = vpop.xlane.xlu0 %1363  ;;  %2014 = vtanh.f32 %v1358_v29  ;;  %v2013_v39 = vpop.eup %2012 }
 0xad7   :  { %v1374_v41 = vmul.f32 1.442695, %v2013_v39 }
 0xad8   :  { %2016 = vpow2.f32 %v1378_v33 }
 0xad9   :  { %2018 = vtanh.f32 %v1364_v60 }
 0xada   :  { %2020 = vpow2.f32 %v1374_v41 }
 0xadc   :  { %v2015_v1 = vpop.eup %2014 }
 0xadd   :  { %v1372_v59 = vmul.f32 1.442695, %v2015_v1 }
 0xade   :  { %v2017_v28 = vpop.eup %2016 }
 0xadf   :  { %v2019_v61 = vpop.eup %2018  ;;  %v1383_v30 = vmul.f32 %v2017_v28, %v1299_v62 }
 0xae0   :  { %v1376_v21 = vmul.f32 1.442695, %v2019_v61  ;;  %v2021_v2 = vpop.eup %2020 }
 0xae1   :  { %1399 = vmatpush.msra.mxu2 %v1383_v30  ;;  %v1381_v44 = vmul.f32 %v2021_v2, %v2755_v57 }
 0xae2   :  { %2022 = vpow2.f32 %v1376_v21 }
 0xae3   :  { %2024 = vpow2.f32 %v1372_v59 }
 0xae8   :  { %v2023_v40 = vpop.eup %2022 }
 0xae9   :  { %v1382_v20 = vmul.f32 %v2023_v40, %v2757_v58  ;;  %v2025_v52 = vpop.eup %2024  ;;  %v2001_v58 = vld [vmem:[%s2799_s2 + $0x40] ss:$0 sm:$0xff] }
 0xaea   :  { %v1380_v22 = vmul.f32 %v2025_v52, %v2753_v38 }
 0xaeb   :  { %1400 = vmatpush.msra.mxu2 %v1382_v20 }
 0xaed   :  { %1401 = vmatpush.msra.mxu2 %v1381_v44 }
 0xaef   :  { %1402 = vmatpush.msra.mxu2 %v1380_v22 }
 0xaf0   :  { %1679 = vmatmul.msk.f32.vlgmr.msra.gmra.mxu2 %vm148_vm0, %v1306_v55 }
 0xaf1   :  { %1419 = vmatpush.msrb.mxu2 %v2017_v28 }
 0xaf3   :  { %1420 = vmatpush.msrb.mxu2 %v2023_v40 }
 0xaf5   :  { %1421 = vmatpush.msrb.mxu2 %v2021_v2 }
 0xaf7   :  { %1422 = vmatpush.msrb.mxu2 %v2025_v52 }
 0xaf8   :  { %1680 = vmatmul.msk.f32.vlgmr.msrb.gmra.mxu2 %vm148_vm0, %v1306_v55 }
 0xb73   :  { %v1404_v45 = vpop.f32.mrf.mxu2 }
 0xb7b   :  { %v1424_v50 = vpop.f32.mrf.mxu2 }
 0xb7c   :  { %1429 = vperm.xlu2 %1997, %v1424_v50  }
 0xbd6   :  { %v1430_v54 = vpop.permute.xlu2 %1429 }
 0xbd7   :  { %2026 = vrcp.f32 %v1430_v54  ;;  %v1443_v56 = vand.u32 2147483648, %v1430_v54  ;;  %v1441_v5 = vand.u32 2147483647, %v1430_v54  ;;  %vm1437_vm9 = vweird.f32 %v1430_v54 }
 0xbd9   :  { %v1444_v48 = vor.u32 1.1754944e-38, %v1443_v56  ;;  %vm1442_vm15 = vcmp.eq.f32.partialorder %v1441_v5, 8.507059e+37 }
 0xbdd   :  { %v2027_v51 = vpop.eup %2026 }
 0xbde   :  { %v1433_v14 = vmul.f32 %v2027_v51, %v1430_v54  ;;  %vm1438_vm7 = vweird.f32 %v2027_v51 }
 0xbdf   :  { %vm1439_vm10 = vmor %vm1437_vm9, %vm1438_vm7 }
 0xbe0   :  { %v1434_v53 = vsub.f32 1.0, %v1433_v14 }
 0xbe2   :  { %v1435_v15 = vmul.f32 %v2027_v51, %v1434_v53 }
 0xbe4   :  { %v1436_v3 = vadd.f32 %v2027_v51, %v1435_v15 }
 0xbe6   :  { %v1440_v49 = vsel %vm1439_vm10, %v2027_v51, %v1436_v3 }
 0xbe7   :  { %v1445_v32 = vsel %vm1442_vm15, %v1444_v48, %v1440_v49 }
 0xbe8   :  { %v1446_v38 = vmul.f32 %v1445_v32, %v1404_v45 }
 0xbea   :  { %v1447_v57 = vpack.c.bf16 %v1446_v38, %v1446_v38 }
 0xbec   :  { %1689 = vmatmul.msk.bf16.vlgmr.msra.gmra.mxu3 %vm148_vm0, %v1447_v57 }
 0xc6f   :  { %v1478_v62 = vpop.f32.mrf.mxu3 }
 0xc70   :  { %v1479_v63 = vadd.f32 %v2001_v58, %v1478_v62 }
 0xc72   :  { %1482 = vst [vmem:[%s2797_s4] sm:$0xff] %v1479_v63 }
 0xc77   :  { %v1480_v18 = vpop.f32.mrf.mxu3 }

</bundles_post_ra>
